<compile_context>
chip_gen: v7x
topology: tpu7x:2x2x1
jax: 0.10.0
libtpu: 0.0.40
codegen_flags: <defaults>
</compile_context>

<pallas_src>
import jax
import jax.numpy as jnp
from jax import lax
from jax.experimental import pallas as pl
from jax.experimental.pallas import tpu as pltpu


# ----------------------------- Pallas kernel ------------------------------- #
def decoder_kernel(ids_ref,                       # [T*B, 1] int32
                   h0_ref, c0_ref,                # [L, B, H] f32
                   emb_ref,                       # [V, E]    bf16
                   w_ih0_ref, w_hh0_ref, b0_ref,  # [E,4H],[H,4H] bf16, [1,4H] f32
                   w_ih1_ref, w_hh1_ref, b1_ref,  # [H,4H],[H,4H] bf16, [1,4H] f32
                   wfc_ref, bfc_ref,              # [H, V] bf16, [1, V] f32
                   preds_ref,                     # [T*B, V] f32   (out)
                   hout_ref, cout_ref,            # [L, B, H] f32  (out, carries state)
                   gih0_ref,                      # [T*B, 4H] f32  (scratch)
                   h1all_ref):                    # [T*B, H]  f32  (scratch)
    TB = ids_ref.shape[0]
    V = emb_ref.shape[0]
    B = hout_ref.shape[1]
    H = hout_ref.shape[2]
    T = TB // B

    # ---------------- prologue (off the recurrent critical path) ----------- #
    # Embedding lookup for all T*B tokens: one-hot @ table on the MXU
    # (one-hot x bf16 rows reproduces the table rows exactly).
    ids = ids_ref[...]                                               # [TB, 1]
    one_hot = (ids == lax.broadcasted_iota(jnp.int32, (TB, V), 1)
               ).astype(emb_ref.dtype)                               # [TB, V] bf16
    x_all = jnp.dot(one_hot, emb_ref[...],
                    preferred_element_type=jnp.float32)              # [TB, E] f32
    # dropout(embedded) is identity in eval mode.

    # Layer-0 input-to-hidden projection batched over all T steps (+ bias).
    gih0_ref[...] = (jnp.dot(x_all.astype(w_ih0_ref.dtype), w_ih0_ref[...],
                             preferred_element_type=jnp.float32)
                     + b0_ref[...])                                  # [TB, 4H]

    # Recurrent state lives in the resident output refs.
    hout_ref[...] = h0_ref[...]
    cout_ref[...] = c0_ref[...]

    b1 = b1_ref[...]

    def gates_to_hc(g, c_prev):
        # PyTorch gate order: input, forget, cell(g), output. Gate math in f32.
        i = jax.nn.sigmoid(g[:, 0 * H:1 * H])
        f = jax.nn.sigmoid(g[:, 1 * H:2 * H])
        gg = jnp.tanh(g[:, 2 * H:3 * H])
        o = jax.nn.sigmoid(g[:, 3 * H:4 * H])
        c_new = f * c_prev + i * gg
        h_new = o * jnp.tanh(c_new)
        return h_new, c_new

    # ---------------- recurrence over T steps (serial) ---------------------- #
    @pl.loop(0, T)
    def _(t):
        row = pl.multiple_of(t * B, B)

        h_prev0 = hout_ref[0]
        c_prev0 = cout_ref[0]
        h_prev1 = hout_ref[1]
        c_prev1 = cout_ref[1]

        # layer 0: precomputed (x @ W_ih0 + b0) + h @ W_hh0
        g0 = gih0_ref[pl.ds(row, B), :] + jnp.dot(
            h_prev0.astype(w_hh0_ref.dtype), w_hh0_ref[...],
            preferred_element_type=jnp.float32)
        h_l0, c_l0 = gates_to_hc(g0, c_prev0)

        # nn.LSTM inter-layer dropout: identity in eval mode.
        # layer 1: two K=H matmuls (no concat / relayout).
        g1 = (jnp.dot(h_l0.astype(w_ih1_ref.dtype), w_ih1_ref[...],
                      preferred_element_type=jnp.float32)
              + jnp.dot(h_prev1.astype(w_hh1_ref.dtype), w_hh1_ref[...],
                        preferred_element_type=jnp.float32)
              + b1)
        h_l1, c_l1 = gates_to_hc(g1, c_prev1)

        hout_ref[0] = h_l0
        hout_ref[1] = h_l1
        cout_ref[0] = c_l0
        cout_ref[1] = c_l1
        h1all_ref[pl.ds(row, B), :] = h_l1

    # ---------------- epilogue: one batched fc_out over T*B rows ------------ #
    preds_ref[...] = (jnp.dot(h1all_ref[...].astype(wfc_ref.dtype), wfc_ref[...],
                              preferred_element_type=jnp.float32)
                      + bfc_ref[...])


# ------------------------------- wrappers ----------------------------------- #
def decoder_decode(tokens, hidden, cell, params):
    """Fused T-step (teacher-forced) decode in ONE pallas_call (no grid).

    tokens: [T, B] int32, hidden/cell: [L, B, H] f32.
    Returns (preds [T, B, V] f32, hidden [L, B, H], cell [L, B, H]).
    """
    T, B = tokens.shape
    L, _, H = hidden.shape
    V, _ = params["embedding"].shape

    ids2d = tokens.reshape(T * B, 1).astype(jnp.int32)

    inputs = (
        ids2d, hidden, cell,
        params["embedding"],
        params["w_ih0"], params["w_hh0"], params["b0"],
        params["w_ih1"], params["w_hh1"], params["b1"],
        params["w_fc"], params["b_fc"],
    )

    vmem_spec = pl.BlockSpec(memory_space=pltpu.MemorySpace.VMEM)
    out_shape = (
        jax.ShapeDtypeStruct((T * B, V), jnp.float32),
        jax.ShapeDtypeStruct((L, B, H), jnp.float32),
        jax.ShapeDtypeStruct((L, B, H), jnp.float32),
    )

    preds, h_new, c_new = pl.pallas_call(
        decoder_kernel,
        out_shape=out_shape,
        in_specs=[vmem_spec for _ in inputs],
        out_specs=(vmem_spec, vmem_spec, vmem_spec),
        scratch_shapes=[
            pltpu.VMEM((T * B, 4 * H), jnp.float32),   # batched x @ W_ih0 (+b0)
            pltpu.VMEM((T * B, H), jnp.float32),       # collected top-layer h
        ],
    )(*inputs)
    return preds.reshape(T, B, V), h_new, c_new


def decoder_forward(token_ids, hidden, cell, params):
    """Single decoder step == PyTorch Decoder.forward (input [B], h/c [L,B,H])."""
    preds, h_new, c_new = decoder_decode(token_ids[None, :], hidden, cell, params)
    return preds[0], h_new, c_new


# ------------------------- deterministic params ----------------------------- #
def make_params(key, output_dim, embedding_dim, hidden_dim):
    ks = jax.random.split(key, 9)
    s = 0.05

    def n(k, shape):
        return s * jax.random.normal(k, shape, jnp.float32)

    return {
        # bf16 storage for everything the MXU touches; f32 biases.
        "embedding": n(ks[0], (output_dim, embedding_dim)).astype(jnp.bfloat16),
        # layer 0
        "w_ih0": n(ks[1], (embedding_dim, 4 * hidden_dim)).astype(jnp.bfloat16),
        "w_hh0": n(ks[2], (hidden_dim, 4 * hidden_dim)).astype(jnp.bfloat16),
        "b0": n(ks[3], (1, 4 * hidden_dim)),                       # b_ih0 + b_hh0
        # layer 1
        "w_ih1": n(ks[4], (hidden_dim, 4 * hidden_dim)).astype(jnp.bfloat16),
        "w_hh1": n(ks[5], (hidden_dim, 4 * hidden_dim)).astype(jnp.bfloat16),
        "b1": n(ks[6], (1, 4 * hidden_dim)),                       # b_ih1 + b_hh1
        # fc_out
        "w_fc": n(ks[7], (hidden_dim, output_dim)).astype(jnp.bfloat16),
        "b_fc": n(ks[8], (1, output_dim)),
    }


# ---------------------------- pure-JAX reference ----------------------------- #
def decoder_step_ref(token_ids, hidden, cell, p):
    """Same numerical recipe (bf16 weights, f32 accumulation / gate math)."""
    H = hidden.shape[-1]
    x = jnp.take(p["embedding"], token_ids, axis=0).astype(jnp.float32)

    def cell_fn(x_in, h, c, w_ih, w_hh, b):
        g = (jnp.dot(x_in.astype(jnp.bfloat16), w_ih,
                     preferred_element_type=jnp.float32) + b
             + jnp.dot(h.astype(jnp.bfloat16), w_hh,
                       preferred_element_type=jnp.float32))
        i = jax.nn.sigmoid(g[:, :H])
        f = jax.nn.sigmoid(g[:, H:2 * H])
        gg = jnp.tanh(g[:, 2 * H:3 * H])
        o = jax.nn.sigmoid(g[:, 3 * H:])
        c_new = f * c + i * gg
        return o * jnp.tanh(c_new), c_new

    h0, c0 = cell_fn(x, hidden[0], cell[0], p["w_ih0"], p["w_hh0"], p["b0"])
    h1, c1 = cell_fn(h0, hidden[1], cell[1], p["w_ih1"], p["w_hh1"], p["b1"])
    pred = jnp.dot(h1.astype(jnp.bfloat16), p["w_fc"],
                   preferred_element_type=jnp.float32) + p["b_fc"]
    return pred, jnp.stack([h0, h1]), jnp.stack([c0, c1])


def decoder_decode_ref(tokens, hidden, cell, p):
    preds = []
    h, c = hidden, cell
    for t in range(tokens.shape[0]):
        pred, h, c = decoder_step_ref(tokens[t], h, c, p)
        preds.append(pred)
    return jnp.stack(preds), h, c


# --------------------------------- main -------------------------------------- #
if __name__ == "__main__":
    B = 8            # batch
    E = 128          # embedding_dim
    H = 128          # hidden_dim
    V = 256          # output_dim (vocab size)
    L = 2            # n_layers
    T = 4            # fused decode steps (teacher forcing)

    key = jax.random.PRNGKey(0)
    k_tok, k_h, k_c, k_par = jax.random.split(key, 4)

    params = make_params(k_par, V, E, H)
    tokens = jax.random.randint(k_tok, (T, B), 0, V, dtype=jnp.int32)
    hidden = 0.1 * jax.random.normal(k_h, (L, B, H), jnp.float32)
    cell = 0.1 * jax.random.normal(k_c, (L, B, H), jnp.float32)

    step_fn = jax.jit(decoder_forward)
    decode_fn = jax.jit(decoder_decode)

    # ---- single step: matches Decoder.forward(input, hidden, cell) ---------- #
    pred, h1, c1 = step_fn(tokens[0], hidden, cell, params)
    jax.block_until_ready((pred, h1, c1))
    pred_r, h1_r, c1_r = decoder_step_ref(tokens[0], hidden, cell, params)
    assert jnp.allclose(pred, pred_r, atol=1e-2, rtol=1e-2)
    assert jnp.allclose(h1, h1_r, atol=1e-2, rtol=1e-2)
    assert jnp.allclose(c1, c1_r, atol=1e-2, rtol=1e-2)

    # ---- fused T-step decode: single invocation, weights resident ----------- #
    preds, hT, cT = decode_fn(tokens, hidden, cell, params)
    jax.block_until_ready((preds, hT, cT))
    preds_r, hT_r, cT_r = decoder_decode_ref(tokens, hidden, cell, params)
    assert jnp.allclose(preds, preds_r, atol=1e-2, rtol=1e-2)
    assert jnp.allclose(hT, hT_r, atol=1e-2, rtol=1e-2)
    assert jnp.allclose(cT, cT_r, atol=1e-2, rtol=1e-2)

    print("KERNEL_OK")
</pallas_src>

<mosaic_0001>
module attributes {stable_mosaic.version = 11 : i64} {
  func.func @decoder_kernel(%arg0: memref<8x1xi32, #tpu.memory_space<vmem>>, %arg1: memref<2x8x128xf32, #tpu.memory_space<vmem>>, %arg2: memref<2x8x128xf32, #tpu.memory_space<vmem>>, %arg3: memref<256x128xbf16, #tpu.memory_space<vmem>>, %arg4: memref<128x512xbf16, #tpu.memory_space<vmem>>, %arg5: memref<128x512xbf16, #tpu.memory_space<vmem>>, %arg6: memref<1x512xf32, #tpu.memory_space<vmem>>, %arg7: memref<128x512xbf16, #tpu.memory_space<vmem>>, %arg8: memref<128x512xbf16, #tpu.memory_space<vmem>>, %arg9: memref<1x512xf32, #tpu.memory_space<vmem>>, %arg10: memref<128x256xbf16, #tpu.memory_space<vmem>>, %arg11: memref<1x256xf32, #tpu.memory_space<vmem>>, %arg12: memref<8x256xf32, #tpu.memory_space<vmem>>, %arg13: memref<2x8x128xf32, #tpu.memory_space<vmem>>, %arg14: memref<2x8x128xf32, #tpu.memory_space<vmem>>, %arg15: memref<8x512xf32, #tpu.memory_space<vmem>>, %arg16: memref<8x128xf32, #tpu.memory_space<vmem>>) attributes {dimension_semantics = [], scalar_prefetch = 0 : i64, scratch_operands = 2 : i64, tpu.core_type = #tpu.core_type<tc>} {
    %c0 = arith.constant 0 : index
    %c0_0 = arith.constant 0 : index
    %0 = vector.load %arg0[%c0, %c0_0] : memref<8x1xi32, #tpu.memory_space<vmem>>, vector<8x1xi32>
    %1 = tpu.iota {dimensions = array<i32: 1>} : vector<8x256xi32>
    %2 = vector.broadcast %0 : vector<8x1xi32> to vector<8x256xi32>
    %3 = arith.cmpi eq, %2, %1 : vector<8x256xi32>
    %4 = arith.extui %3 : vector<8x256xi1> to vector<8x256xi32>
    %5 = arith.sitofp %4 : vector<8x256xi32> to vector<8x256xf32>
    %6 = arith.truncf %5 : vector<8x256xf32> to vector<8x256xbf16>
    %c0_1 = arith.constant 0 : index
    %c0_2 = arith.constant 0 : index
    %7 = vector.load %arg3[%c0_1, %c0_2] : memref<256x128xbf16, #tpu.memory_space<vmem>>, vector<256x128xbf16>
    %cst = arith.constant dense<0.000000e+00> : vector<8x128xf32>
    %8 = tpu.matmul %6, %7, %cst {dimension_numbers = #tpu.dot_dimension_numbers<[1], [0], [0], [1], [0, 0, 1, 1], [], []>} : vector<8x256xbf16>, vector<256x128xbf16>, vector<8x128xf32> -> vector<8x128xf32>
    %9 = arith.truncf %8 : vector<8x128xf32> to vector<8x128xbf16>
    %c0_3 = arith.constant 0 : index
    %c0_4 = arith.constant 0 : index
    %10 = vector.load %arg4[%c0_3, %c0_4] : memref<128x512xbf16, #tpu.memory_space<vmem>>, vector<128x512xbf16>
    %cst_5 = arith.constant dense<0.000000e+00> : vector<8x512xf32>
    %11 = tpu.matmul %9, %10, %cst_5 {dimension_numbers = #tpu.dot_dimension_numbers<[1], [0], [0], [1], [0, 0, 1, 1], [], []>} : vector<8x128xbf16>, vector<128x512xbf16>, vector<8x512xf32> -> vector<8x512xf32>
    %c0_6 = arith.constant 0 : index
    %c0_7 = arith.constant 0 : index
    %12 = vector.load %arg6[%c0_6, %c0_7] : memref<1x512xf32, #tpu.memory_space<vmem>>, vector<1x512xf32>
    %13 = vector.broadcast %12 : vector<1x512xf32> to vector<8x512xf32>
    %14 = arith.addf %11, %13 : vector<8x512xf32>
    %c0_8 = arith.constant 0 : index
    %c0_9 = arith.constant 0 : index
    %15 = vector.load %arg15[%c0_8, %c0_9] : memref<8x512xf32, #tpu.memory_space<vmem>>, vector<8x512xf32>
    tpu.vector_store %arg15[%c0_8, %c0_9], %14 {strides = array<i32>} : memref<8x512xf32, #tpu.memory_space<vmem>>, vector<8x512xf32>,
    %c0_10 = arith.constant 0 : index
    %c0_11 = arith.constant 0 : index
    %c0_12 = arith.constant 0 : index
    %16 = vector.load %arg1[%c0_10, %c0_11, %c0_12] : memref<2x8x128xf32, #tpu.memory_space<vmem>>, vector<2x8x128xf32>
    %c0_13 = arith.constant 0 : index
    %c0_14 = arith.constant 0 : index
    %c0_15 = arith.constant 0 : index
    %17 = vector.load %arg13[%c0_13, %c0_14, %c0_15] : memref<2x8x128xf32, #tpu.memory_space<vmem>>, vector<2x8x128xf32>
    tpu.vector_store %arg13[%c0_13, %c0_14, %c0_15], %16 {strides = array<i32>} : memref<2x8x128xf32, #tpu.memory_space<vmem>>, vector<2x8x128xf32>,
    %c0_16 = arith.constant 0 : index
    %c0_17 = arith.constant 0 : index
    %c0_18 = arith.constant 0 : index
    %18 = vector.load %arg2[%c0_16, %c0_17, %c0_18] : memref<2x8x128xf32, #tpu.memory_space<vmem>>, vector<2x8x128xf32>
    %c0_19 = arith.constant 0 : index
    %c0_20 = arith.constant 0 : index
    %c0_21 = arith.constant 0 : index
    %19 = vector.load %arg14[%c0_19, %c0_20, %c0_21] : memref<2x8x128xf32, #tpu.memory_space<vmem>>, vector<2x8x128xf32>
    tpu.vector_store %arg14[%c0_19, %c0_20, %c0_21], %18 {strides = array<i32>} : memref<2x8x128xf32, #tpu.memory_space<vmem>>, vector<2x8x128xf32>,
    %c0_22 = arith.constant 0 : index
    %c0_23 = arith.constant 0 : index
    %20 = vector.load %arg9[%c0_22, %c0_23] : memref<1x512xf32, #tpu.memory_space<vmem>>, vector<1x512xf32>
    %c0_i32 = arith.constant 0 : i32
    %c1_i32 = arith.constant 1 : i32
    %21 = arith.muli %c0_i32, %c1_i32 : i32
    %c0_i32_24 = arith.constant 0 : i32
    %22 = arith.addi %c0_i32_24, %21 : i32
    %c8_i32 = arith.constant 8 : i32
    %23 = arith.muli %22, %c8_i32 : i32
    %24 = tpu.assume_multiple %23, 8 : i32
    %c0_25 = arith.constant 0 : index
    %c0_26 = arith.constant 0 : index
    %c0_27 = arith.constant 0 : index
    %25 = vector.load %arg13[%c0_25, %c0_26, %c0_27] : memref<2x8x128xf32, #tpu.memory_space<vmem>>, vector<1x8x128xf32>
    %26 = vector.shape_cast %25 : vector<1x8x128xf32> to vector<8x128xf32>
    %c0_28 = arith.constant 0 : index
    %c0_29 = arith.constant 0 : index
    %c0_30 = arith.constant 0 : index
    %27 = vector.load %arg14[%c0_28, %c0_29, %c0_30] : memref<2x8x128xf32, #tpu.memory_space<vmem>>, vector<1x8x128xf32>
    %28 = vector.shape_cast %27 : vector<1x8x128xf32> to vector<8x128xf32>
    %c1 = arith.constant 1 : index
    %c0_31 = arith.constant 0 : index
    %c0_32 = arith.constant 0 : index
    %29 = vector.load %arg13[%c1, %c0_31, %c0_32] : memref<2x8x128xf32, #tpu.memory_space<vmem>>, vector<1x8x128xf32>
    %30 = vector.shape_cast %29 : vector<1x8x128xf32> to vector<8x128xf32>
    %c1_33 = arith.constant 1 : index
    %c0_34 = arith.constant 0 : index
    %c0_35 = arith.constant 0 : index
    %31 = vector.load %arg14[%c1_33, %c0_34, %c0_35] : memref<2x8x128xf32, #tpu.memory_space<vmem>>, vector<1x8x128xf32>
    %32 = vector.shape_cast %31 : vector<1x8x128xf32> to vector<8x128xf32>
    %33 = arith.index_cast %24 : i32 to index
    %c0_36 = arith.constant 0 : index
    %34 = vector.load %arg15[%33, %c0_36] : memref<8x512xf32, #tpu.memory_space<vmem>>, vector<8x512xf32>
    %35 = arith.truncf %26 : vector<8x128xf32> to vector<8x128xbf16>
    %c0_37 = arith.constant 0 : index
    %c0_38 = arith.constant 0 : index
    %36 = vector.load %arg5[%c0_37, %c0_38] : memref<128x512xbf16, #tpu.memory_space<vmem>>, vector<128x512xbf16>
    %cst_39 = arith.constant dense<0.000000e+00> : vector<8x512xf32>
    %37 = tpu.matmul %35, %36, %cst_39 {dimension_numbers = #tpu.dot_dimension_numbers<[1], [0], [0], [1], [0, 0, 1, 1], [], []>} : vector<8x128xbf16>, vector<128x512xbf16>, vector<8x512xf32> -> vector<8x512xf32>
    %38 = arith.addf %34, %37 : vector<8x512xf32>
    %39 = vector.extract_strided_slice %38 {offsets = [0, 0], sizes = [8, 128], strides = [1, 1]} : vector<8x512xf32> to vector<8x128xf32>
    %40 = arith.negf %39 : vector<8x128xf32>
    %41 = math.exp %40 : vector<8x128xf32>
    %cst_40 = arith.constant 1.000000e+00 : f32
    %42 = vector.broadcast %cst_40 : f32 to vector<8x128xf32>
    %43 = arith.addf %42, %41 : vector<8x128xf32>
    %44 = arith.divf %42, %43 : vector<8x128xf32>
    %45 = vector.extract_strided_slice %38 {offsets = [0, 128], sizes = [8, 128], strides = [1, 1]} : vector<8x512xf32> to vector<8x128xf32>
    %46 = arith.negf %45 : vector<8x128xf32>
    %47 = math.exp %46 : vector<8x128xf32>
    %cst_41 = arith.constant 1.000000e+00 : f32
    %48 = vector.broadcast %cst_41 : f32 to vector<8x128xf32>
    %49 = arith.addf %48, %47 : vector<8x128xf32>
    %50 = arith.divf %48, %49 : vector<8x128xf32>
    %51 = vector.extract_strided_slice %38 {offsets = [0, 256], sizes = [8, 128], strides = [1, 1]} : vector<8x512xf32> to vector<8x128xf32>
    %52 = math.tanh %51 : vector<8x128xf32>
    %53 = vector.extract_strided_slice %38 {offsets = [0, 384], sizes = [8, 128], strides = [1, 1]} : vector<8x512xf32> to vector<8x128xf32>
    %54 = arith.negf %53 : vector<8x128xf32>
    %55 = math.exp %54 : vector<8x128xf32>
    %cst_42 = arith.constant 1.000000e+00 : f32
    %56 = vector.broadcast %cst_42 : f32 to vector<8x128xf32>
    %57 = arith.addf %56, %55 : vector<8x128xf32>
    %58 = arith.divf %56, %57 : vector<8x128xf32>
    %59 = arith.mulf %50, %28 : vector<8x128xf32>
    %60 = arith.mulf %44, %52 : vector<8x128xf32>
    %61 = arith.addf %59, %60 : vector<8x128xf32>
    %62 = math.tanh %61 : vector<8x128xf32>
    %63 = arith.mulf %58, %62 : vector<8x128xf32>
    %64 = arith.truncf %63 : vector<8x128xf32> to vector<8x128xbf16>
    %c0_43 = arith.constant 0 : index
    %c0_44 = arith.constant 0 : index
    %65 = vector.load %arg7[%c0_43, %c0_44] : memref<128x512xbf16, #tpu.memory_space<vmem>>, vector<128x512xbf16>
    %cst_45 = arith.constant dense<0.000000e+00> : vector<8x512xf32>
    %66 = tpu.matmul %64, %65, %cst_45 {dimension_numbers = #tpu.dot_dimension_numbers<[1], [0], [0], [1], [0, 0, 1, 1], [], []>} : vector<8x128xbf16>, vector<128x512xbf16>, vector<8x512xf32> -> vector<8x512xf32>
    %67 = arith.truncf %30 : vector<8x128xf32> to vector<8x128xbf16>
    %c0_46 = arith.constant 0 : index
    %c0_47 = arith.constant 0 : index
    %68 = vector.load %arg8[%c0_46, %c0_47] : memref<128x512xbf16, #tpu.memory_space<vmem>>, vector<128x512xbf16>
    %cst_48 = arith.constant dense<0.000000e+00> : vector<8x512xf32>
    %69 = tpu.matmul %67, %68, %cst_48 {dimension_numbers = #tpu.dot_dimension_numbers<[1], [0], [0], [1], [0, 0, 1, 1], [], []>} : vector<8x128xbf16>, vector<128x512xbf16>, vector<8x512xf32> -> vector<8x512xf32>
    %70 = arith.addf %66, %69 : vector<8x512xf32>
    %71 = vector.broadcast %20 : vector<1x512xf32> to vector<8x512xf32>
    %72 = arith.addf %70, %71 : vector<8x512xf32>
    %73 = vector.extract_strided_slice %72 {offsets = [0, 0], sizes = [8, 128], strides = [1, 1]} : vector<8x512xf32> to vector<8x128xf32>
    %74 = arith.negf %73 : vector<8x128xf32>
    %75 = math.exp %74 : vector<8x128xf32>
    %cst_49 = arith.constant 1.000000e+00 : f32
    %76 = vector.broadcast %cst_49 : f32 to vector<8x128xf32>
    %77 = arith.addf %76, %75 : vector<8x128xf32>
    %78 = arith.divf %76, %77 : vector<8x128xf32>
    %79 = vector.extract_strided_slice %72 {offsets = [0, 128], sizes = [8, 128], strides = [1, 1]} : vector<8x512xf32> to vector<8x128xf32>
    %80 = arith.negf %79 : vector<8x128xf32>
    %81 = math.exp %80 : vector<8x128xf32>
    %cst_50 = arith.constant 1.000000e+00 : f32
    %82 = vector.broadcast %cst_50 : f32 to vector<8x128xf32>
    %83 = arith.addf %82, %81 : vector<8x128xf32>
    %84 = arith.divf %82, %83 : vector<8x128xf32>
    %85 = vector.extract_strided_slice %72 {offsets = [0, 256], sizes = [8, 128], strides = [1, 1]} : vector<8x512xf32> to vector<8x128xf32>
    %86 = math.tanh %85 : vector<8x128xf32>
    %87 = vector.extract_strided_slice %72 {offsets = [0, 384], sizes = [8, 128], strides = [1, 1]} : vector<8x512xf32> to vector<8x128xf32>
    %88 = arith.negf %87 : vector<8x128xf32>
    %89 = math.exp %88 : vector<8x128xf32>
    %cst_51 = arith.constant 1.000000e+00 : f32
    %90 = vector.broadcast %cst_51 : f32 to vector<8x128xf32>
    %91 = arith.addf %90, %89 : vector<8x128xf32>
    %92 = arith.divf %90, %91 : vector<8x128xf32>
    %93 = arith.mulf %84, %32 : vector<8x128xf32>
    %94 = arith.mulf %78, %86 : vector<8x128xf32>
    %95 = arith.addf %93, %94 : vector<8x128xf32>
    %96 = math.tanh %95 : vector<8x128xf32>
    %97 = arith.mulf %92, %96 : vector<8x128xf32>
    %c0_52 = arith.constant 0 : index
    %c0_53 = arith.constant 0 : index
    %c0_54 = arith.constant 0 : index
    %98 = vector.load %arg13[%c0_52, %c0_53, %c0_54] : memref<2x8x128xf32, #tpu.memory_space<vmem>>, vector<1x8x128xf32>
    %99 = vector.shape_cast %98 : vector<1x8x128xf32> to vector<8x128xf32>
    %100 = vector.shape_cast %63 : vector<8x128xf32> to vector<1x8x128xf32>
    tpu.vector_store %arg13[%c0_52, %c0_53, %c0_54], %100 {strides = array<i32>} : memref<2x8x128xf32, #tpu.memory_space<vmem>>, vector<1x8x128xf32>,
    %c1_55 = arith.constant 1 : index
    %c0_56 = arith.constant 0 : index
    %c0_57 = arith.constant 0 : index
    %101 = vector.load %arg13[%c1_55, %c0_56, %c0_57] : memref<2x8x128xf32, #tpu.memory_space<vmem>>, vector<1x8x128xf32>
    %102 = vector.shape_cast %101 : vector<1x8x128xf32> to vector<8x128xf32>
    %103 = vector.shape_cast %97 : vector<8x128xf32> to vector<1x8x128xf32>
    tpu.vector_store %arg13[%c1_55, %c0_56, %c0_57], %103 {strides = array<i32>} : memref<2x8x128xf32, #tpu.memory_space<vmem>>, vector<1x8x128xf32>,
    %c0_58 = arith.constant 0 : index
    %c0_59 = arith.constant 0 : index
    %c0_60 = arith.constant 0 : index
    %104 = vector.load %arg14[%c0_58, %c0_59, %c0_60] : memref<2x8x128xf32, #tpu.memory_space<vmem>>, vector<1x8x128xf32>
    %105 = vector.shape_cast %104 : vector<1x8x128xf32> to vector<8x128xf32>
    %106 = vector.shape_cast %61 : vector<8x128xf32> to vector<1x8x128xf32>
    tpu.vector_store %arg14[%c0_58, %c0_59, %c0_60], %106 {strides = array<i32>} : memref<2x8x128xf32, #tpu.memory_space<vmem>>, vector<1x8x128xf32>,
    %c1_61 = arith.constant 1 : index
    %c0_62 = arith.constant 0 : index
    %c0_63 = arith.constant 0 : index
    %107 = vector.load %arg14[%c1_61, %c0_62, %c0_63] : memref<2x8x128xf32, #tpu.memory_space<vmem>>, vector<1x8x128xf32>
    %108 = vector.shape_cast %107 : vector<1x8x128xf32> to vector<8x128xf32>
    %109 = vector.shape_cast %95 : vector<8x128xf32> to vector<1x8x128xf32>
    tpu.vector_store %arg14[%c1_61, %c0_62, %c0_63], %109 {strides = array<i32>} : memref<2x8x128xf32, #tpu.memory_space<vmem>>, vector<1x8x128xf32>,
    %110 = arith.index_cast %24 : i32 to index
    %c0_64 = arith.constant 0 : index
    %111 = vector.load %arg16[%110, %c0_64] : memref<8x128xf32, #tpu.memory_space<vmem>>, vector<8x128xf32>
    tpu.vector_store %arg16[%110, %c0_64], %97 {strides = array<i32>} : memref<8x128xf32, #tpu.memory_space<vmem>>, vector<8x128xf32>,
    %c1_i32_65 = arith.constant 1 : i32
    %c0_66 = arith.constant 0 : index
    %c0_67 = arith.constant 0 : index
    %112 = vector.load %arg16[%c0_66, %c0_67] : memref<8x128xf32, #tpu.memory_space<vmem>>, vector<8x128xf32>
    %113 = arith.truncf %112 : vector<8x128xf32> to vector<8x128xbf16>
    %c0_68 = arith.constant 0 : index
    %c0_69 = arith.constant 0 : index
    %114 = vector.load %arg10[%c0_68, %c0_69] : memref<128x256xbf16, #tpu.memory_space<vmem>>, vector<128x256xbf16>
    %cst_70 = arith.constant dense<0.000000e+00> : vector<8x256xf32>
    %115 = tpu.matmul %113, %114, %cst_70 {dimension_numbers = #tpu.dot_dimension_numbers<[1], [0], [0], [1], [0, 0, 1, 1], [], []>} : vector<8x128xbf16>, vector<128x256xbf16>, vector<8x256xf32> -> vector<8x256xf32>
    %c0_71 = arith.constant 0 : index
    %c0_72 = arith.constant 0 : index
    %116 = vector.load %arg11[%c0_71, %c0_72] : memref<1x256xf32, #tpu.memory_space<vmem>>, vector<1x256xf32>
    %117 = vector.broadcast %116 : vector<1x256xf32> to vector<8x256xf32>
    %118 = arith.addf %115, %117 : vector<8x256xf32>
    %c0_73 = arith.constant 0 : index
    %c0_74 = arith.constant 0 : index
    %119 = vector.load %arg12[%c0_73, %c0_74] : memref<8x256xf32, #tpu.memory_space<vmem>>, vector<8x256xf32>
    tpu.vector_store %arg12[%c0_73, %c0_74], %118 {strides = array<i32>} : memref<8x256xf32, #tpu.memory_space<vmem>>, vector<8x256xf32>,
    return
  }
}

</mosaic_0001>

<bundles_post_ra>
// kernel: decoder_forward.1
= control target key start
LH: loop header
LB: loop body
LE: loop exit
PB: predicated region body
PF: predicated region fallthrough
CT: control target
= control target key end

     0   :  { %20 = vsyncpa [#allocation5], 0  ;;  %s2776_s0 = inlined_call_operand.vmem [shape: s32[8,1], index: 0, kind: input, shape index: {}]   ;;  %s2777_s1 = inlined_call_operand.vmem [shape: f32[2,8,128], index: 1, kind: input, shape index: {}]   ;;  %s2778_s2 = inlined_call_operand.hbm [shape: f32[2,8,128], index: 2, kind: input, shape index: {}]   ;;  %s2779_s3 = inlined_call_operand.hbm [shape: bf16[256,128], index: 3, kind: input, shape index: {}]   ;;  %s2780_s4 = inlined_call_operand.hbm [shape: bf16[128,512], index: 4, kind: input, shape index: {}]   ;;  %s2781_s5 = inlined_call_operand.hbm [shape: bf16[128,512], index: 5, kind: input, shape index: {}]   ;;  %s2782_s6 = inlined_call_operand.vmem [shape: f32[1,512], index: 6, kind: input, shape index: {}]   ;;  %s2783_s7 = inlined_call_operand.hbm [shape: bf16[128,512], index: 7, kind: input, shape index: {}]   ;;  %s2784_s8 = inlined_call_operand.hbm [shape: bf16[128,512], index: 8, kind: input, shape index: {}]   ;;  %s2785_s9 = inlined_call_operand.vmem [shape: f32[1,512], index: 9, kind: input, shape index: {}]   ;;  %s2786_s10 = inlined_call_operand.hbm [shape: bf16[128,256], index: 10, kind: input, shape index: {}]   ;;  %s2787_s11 = inlined_call_operand.vmem [shape: f32[1,256], index: 11, kind: input, shape index: {}]   ;;  %s2788_s12 = inlined_call_operand.hbm [shape: f32[8,256], index: 12, kind: output, shape index: {0}]   ;;  %s2789_s13 = inlined_call_operand.hbm [shape: f32[2,8,128], index: 13, kind: output, shape index: {1}]   ;;  %s2790_s14 = inlined_call_operand.hbm [shape: f32[2,8,128], index: 14, kind: output, shape index: {2}]  }
   0x1   :  { %21 = vsyncpa [#allocation8], 0 }
   0x2   :  { %22 = vsyncpa [#allocation11], 0 }
   0x3   :  { %23 = vsyncpa [#allocation14], 0 }
   0x4   :  { %24 = vsyncpa [#allocation6], 0 }
   0x5   :  { %25 = vsyncpa [#allocation18], 0  ;;  %s2478_s29 = smov [#allocation7]   ;;  %s2246_s17 = scalar_lea.hbm %s2779_s3, 2048 }
   0x6   :  { %s47_s30 = sshll.u32 %s2478_s29, 4  ;;  %p2247_p0 = scmp.ne.s32.totalorder %s2779_s3, %s2246_s17  ;;  %s48_s30 = int_to_ptr.vmem [resolvable:$true] %s47_s30 }
   0x7   :  { %p2250_p1 = scmp.lt.u32.totalorder %s2246_s17, %s2779_s3 }
   0x9   :  { %p2252_p2 = pnand %p2250_p1, %p2247_p0 }
   0xb   :  { %2255 = shalt.err (!%p2252_p2)
}
   0xc   :  { %s2256_s22 = scalar_lea.vmem %s48_s30, 2048  ;;  %p2261_p4 = scmp.lt.s32.totalorder %s48_s30, %s48_s30 }
   0xd   :  { %p2257_p3 = scmp.ne.s32.totalorder %s48_s30, %s2256_s22  ;;  %p2262_p5 = scmp.lt.s32.totalorder %s2256_s22, %s2256_s22 }
   0xf   :  { %p2263_p6 = por %p2262_p5, %p2261_p4 }
  0x11   :  { %p2264_p7 = pnand %p2263_p6, %p2257_p3 }
  0x13   :  { %2267 = shalt.err (!%p2264_p7)
}
  0x14   :  { %s2479_s23 = smov 64   ;;  %s2480_s24 = smov 4  }
  0x15   :  { %53 = dma.hbm_to_vmem [thread:$0]  %s2779_s3, 2048, %s48_s30, [#allocation8], %s2479_s23, %s2479_s23, %s2480_s24  }
  0x16   :  { %s2481_s27 = smov [#allocation10]   ;;  %s2482_s29 = smov [#allocation13]  }
  0x17   :  { %s71_s28 = sshll.u32 %s2481_s27, 4  ;;  %s97_s15 = sshll.u32 %s2482_s29, 4  ;;  %s72_s28 = int_to_ptr.vmem [resolvable:$true] %s71_s28  ;;  %s98_s15 = int_to_ptr.vmem [resolvable:$true] %s97_s15 }
  0x18   :  { %s2268_s18 = scalar_lea.hbm %s2781_s5, 4096 }
  0x19   :  { %p2269_p8 = scmp.ne.s32.totalorder %s2781_s5, %s2268_s18  ;;  %p2272_p9 = scmp.lt.u32.totalorder %s2268_s18, %s2781_s5 }
  0x1b   :  { %p2274_p10 = pnand %p2272_p9, %p2269_p8 }
  0x1d   :  { %2277 = shalt.err (!%p2274_p10)
}
  0x1e   :  { %s2278_s3 = scalar_lea.vmem %s72_s28, 4096  ;;  %p2283_p12 = scmp.lt.s32.totalorder %s72_s28, %s72_s28 }
  0x1f   :  { %p2279_p11 = scmp.ne.s32.totalorder %s72_s28, %s2278_s3  ;;  %p2284_p13 = scmp.lt.s32.totalorder %s2278_s3, %s2278_s3 }
  0x21   :  { %p2285_p0 = por %p2284_p13, %p2283_p12 }
  0x23   :  { %p2286_p1 = pnand %p2285_p0, %p2279_p11 }
  0x25   :  { %2289 = shalt.err (!%p2286_p1)
}
  0x26   :  { %s2483_s30 = smov 256   ;;  %s2484_s23 = smov 16  }
  0x27   :  { %77 = dma.hbm_to_vmem [thread:$0]  %s2781_s5, 4096, %s72_s28, [#allocation11], %s2483_s30, %s2483_s30, %s2484_s23  }
  0x28   :  { %s2290_s29 = scalar_lea.hbm %s2784_s8, 4096 }
  0x29   :  { %p2291_p2 = scmp.ne.s32.totalorder %s2784_s8, %s2290_s29  ;;  %p2294_p3 = scmp.lt.u32.totalorder %s2290_s29, %s2784_s8 }
  0x2b   :  { %p2296_p4 = pnand %p2294_p3, %p2291_p2 }
  0x2d   :  { %2299 = shalt.err (!%p2296_p4)
}
  0x2e   :  { %s2300_s20 = scalar_lea.vmem %s98_s15, 4096  ;;  %p2305_p6 = scmp.lt.s32.totalorder %s98_s15, %s98_s15 }
  0x2f   :  { %p2301_p5 = scmp.ne.s32.totalorder %s98_s15, %s2300_s20  ;;  %p2306_p7 = scmp.lt.s32.totalorder %s2300_s20, %s2300_s20 }
  0x31   :  { %p2307_p8 = por %p2306_p7, %p2305_p6 }
  0x33   :  { %p2308_p9 = pnand %p2307_p8, %p2301_p5 }
  0x35   :  { %2311 = shalt.err (!%p2308_p9)
}
  0x36   :  { %103 = dma.hbm_to_vmem [thread:$0]  %s2784_s8, 4096, %s98_s15, [#allocation14], %s2483_s30, %s2483_s30, %s2484_s23  }
  0x37   :  { %s2485_s21 = smov [#allocation4]   ;;  %s2312_s25 = scalar_lea.hbm %s2778_s2, 256 }
  0x38   :  { %s35_s22 = sshll.u32 %s2485_s21, 4  ;;  %p2313_p10 = scmp.ne.s32.totalorder %s2778_s2, %s2312_s25  ;;  %s36_s22 = int_to_ptr.vmem [resolvable:$true] %s35_s22 }
  0x39   :  { %p2316_p11 = scmp.lt.u32.totalorder %s2312_s25, %s2778_s2 }
  0x3b   :  { %p2318_p12 = pnand %p2316_p11, %p2313_p10 }
  0x3d   :  { %2321 = shalt.err (!%p2318_p12)
}
  0x3e   :  { %s2322_s17 = scalar_lea.vmem %s36_s22, 256  ;;  %p2327_p0 = scmp.lt.s32.totalorder %s36_s22, %s36_s22 }
  0x3f   :  { %p2323_p13 = scmp.ne.s32.totalorder %s36_s22, %s2322_s17  ;;  %p2328_p1 = scmp.lt.s32.totalorder %s2322_s17, %s2322_s17 }
  0x41   :  { %p2329_p2 = por %p2328_p1, %p2327_p0 }
  0x43   :  { %p2330_p3 = pnand %p2329_p2, %p2323_p13 }
  0x45   :  { %2333 = shalt.err (!%p2330_p3)
}
  0x46   :  { %s2486_s8 = smov 128   ;;  %s2487_s15 = smov 8  }
  0x47   :  { %41 = dma.hbm_to_vmem [thread:$0]  %s2778_s2, 256, %s36_s22, [#allocation5], %s2486_s8, %s2486_s8, %s2487_s15  }
  0x48   :  { %s2488_s20 = smov [#allocation9]   ;;  %s2489_s28 = smov [#allocation12]  }
  0x49   :  { %s59_s5 = sshll.u32 %s2488_s20, 4  ;;  %s85_s21 = sshll.u32 %s2489_s28, 4  ;;  %s60_s5 = int_to_ptr.vmem [resolvable:$true] %s59_s5  ;;  %s2628_s21 = int_to_ptr.vmem [resolvable:$true] %s85_s21 }
  0x4a   :  { %s2334_s25 = scalar_lea.hbm %s2780_s4, 4096 }
  0x4b   :  { %p2335_p4 = scmp.ne.s32.totalorder %s2780_s4, %s2334_s25  ;;  %p2338_p5 = scmp.lt.u32.totalorder %s2334_s25, %s2780_s4 }
  0x4d   :  { %p2340_p6 = pnand %p2338_p5, %p2335_p4 }
  0x4f   :  { %2343 = shalt.err (!%p2340_p6)
}
  0x50   :  { %s2344_s2 = scalar_lea.vmem %s60_s5, 4096  ;;  %p2349_p8 = scmp.lt.s32.totalorder %s60_s5, %s60_s5 }
  0x51   :  { %p2345_p7 = scmp.ne.s32.totalorder %s60_s5, %s2344_s2  ;;  %p2350_p9 = scmp.lt.s32.totalorder %s2344_s2, %s2344_s2 }
  0x53   :  { %p2351_p10 = por %p2350_p9, %p2349_p8 }
  0x55   :  { %p2352_p11 = pnand %p2351_p10, %p2345_p7 }
  0x57   :  { %2355 = shalt.err (!%p2352_p11)
}
  0x58   :  { %65 = dma.hbm_to_vmem [thread:$0]  %s2780_s4, 4096, %s60_s5, [#allocation8], %s2483_s30, %s2483_s30, %s2484_s23  }
  0x59   :  { %s2356_s20 = scalar_lea.hbm %s2783_s7, 4096 }
  0x5a   :  { %p2357_p12 = scmp.ne.s32.totalorder %s2783_s7, %s2356_s20  ;;  %p2360_p13 = scmp.lt.u32.totalorder %s2356_s20, %s2783_s7 }
  0x5c   :  { %p2362_p0 = pnand %p2360_p13, %p2357_p12 }
  0x5e   :  { %2365 = shalt.err (!%p2362_p0)
}
  0x5f   :  { %s2366_s26 = scalar_lea.vmem %s2628_s21, 4096  ;;  %p2371_p2 = scmp.lt.s32.totalorder %s2628_s21, %s2628_s21 }
  0x60   :  { %p2367_p1 = scmp.ne.s32.totalorder %s2628_s21, %s2366_s26  ;;  %p2372_p3 = scmp.lt.s32.totalorder %s2366_s26, %s2366_s26 }
  0x62   :  { %p2373_p4 = por %p2372_p3, %p2371_p2 }
  0x64   :  { %p2374_p5 = pnand %p2373_p4, %p2367_p1 }
  0x66   :  { %2377 = shalt.err (!%p2374_p5)
}
  0x67   :  { %91 = dma.hbm_to_vmem [thread:$0]  %s2783_s7, 4096, %s2628_s21, [#allocation11], %s2483_s30, %s2483_s30, %s2484_s23  }
  0x68   :  { %s2490_s27 = smov [#allocation15]   ;;  %s2378_s22 = scalar_lea.hbm %s2786_s10, 2048 }
  0x69   :  { %s111_s29 = sshll.u32 %s2490_s27, 4  ;;  %p2379_p6 = scmp.ne.s32.totalorder %s2786_s10, %s2378_s22  ;;  %s112_s29 = int_to_ptr.vmem [resolvable:$true] %s111_s29 }
  0x6a   :  { %p2382_p7 = scmp.lt.u32.totalorder %s2378_s22, %s2786_s10 }
  0x6c   :  { %p2384_p8 = pnand %p2382_p7, %p2379_p6 }
  0x6e   :  { %2387 = shalt.err (!%p2384_p8)
}
  0x6f   :  { %s2388_s28 = scalar_lea.vmem %s112_s29, 2048  ;;  %p2393_p10 = scmp.lt.s32.totalorder %s112_s29, %s112_s29 }
  0x70   :  { %p2389_p9 = scmp.ne.s32.totalorder %s112_s29, %s2388_s28  ;;  %p2394_p11 = scmp.lt.s32.totalorder %s2388_s28, %s2388_s28 }
  0x72   :  { %p2395_p12 = por %p2394_p11, %p2393_p10 }
  0x74   :  { %p2396_p13 = pnand %p2395_p12, %p2389_p9 }
  0x76   :  { %2399 = shalt.err (!%p2396_p13)
}
  0x77   :  { %117 = dma.hbm_to_vmem [thread:$0]  %s2786_s10, 2048, %s112_s29, [#allocation14], %s2486_s8, %s2486_s8, %s2487_s15  }
  0x78   :  { %2466 = dma.done.wait [#allocation5], 256  }
  0x79   :  { %2467 = vsyncadd [#allocation5], 4294967040 }
  0x7a   :  { %2468 = dma.done.wait [#allocation8], 6144  }
  0x7b   :  { %2469 = vsyncadd [#allocation8], 4294961152 }
  0x7c   :  { %2470 = dma.done.wait [#allocation11], 8192  }
  0x7d   :  { %2471 = vsyncadd [#allocation11], 4294959104 }
  0x7e   :  { %2472 = dma.done.wait [#allocation14], 6144  }
  0x7f   :  { %2473 = vsyncadd [#allocation14], 4294961152  ;;  %v2491_v0 = vmov 0   ;;  %v142_v1 = vld [vmem:[%s2776_s0] sm:$0xff]  ;;  %v1982_v2 = vld [vmem:[#allocation7 + $0x40] sm:$0xff]   ;;  %v143_v33 = vlaneseq }
  0x80   :  { %1981 = vset.pattern.permute.xlu0 %v2491_v0  ;;  %572 = vmatprep.mubr.bf16.mxu1 %v2491_v0  ;;  %v1983_v3 = vld [vmem:[#allocation7] sm:$0xff]   ;;  %v1984_v4 = vld [vmem:[#allocation7 + $0x48] sm:$0xff]   ;;  %v1986_v6 = vld [vmem:[#allocation7 + $0x50] sm:$0xff]   ;;  %v2492_v39 = vmov 1.0|1.0  }
  0x81   :  { %147 = vperm.xlu0 %1981, %v142_v1   ;;  %1929 = vmatprep.subr.bf16.mxu0 %v1982_v2  ;;  %v1985_v5 = vld [vmem:[#allocation7 + $0x8] sm:$0xff]   ;;  %v1987_v7 = vld [vmem:[#allocation7 + $0x10] sm:$0xff]   ;;  %v1988_v8 = vld [vmem:[#allocation7 + $0x58] sm:$0xff]   ;;  %v144_v34 = vand.u32 127, %v143_v33 }
  0x82   :  { %1930 = vmatpush3.bf16.msra.mxu0 %v1983_v3  ;;  %v1989_v9 = vld [vmem:[#allocation7 + $0x18] sm:$0xff]   ;;  %v1990_v10 = vld [vmem:[#allocation7 + $0x60] sm:$0xff]   ;;  %v1992_v12 = vld [vmem:[#allocation7 + $0x68] sm:$0xff]  }
  0x83   :  { %1931 = vmatprep.subr.bf16.mxu0 %v1984_v4  ;;  %v1991_v11 = vld [vmem:[#allocation7 + $0x20] sm:$0xff]   ;;  %v1993_v16 = vld [vmem:[#allocation7 + $0x28] sm:$0xff]   ;;  %v1994_v17 = vld [vmem:[#allocation7 + $0x70] sm:$0xff]   ;;  %v145_v35 = vadd.s32 128, %v144_v34 }
  0x84   :  { %v1998_v13 = vld [vmem:[#allocation9 + $0x4] ss:$16 sps:$4 sm:$0xff]   ;;  %v2003_v14 = vld [vmem:[#allocation9] ss:$16 sps:$4 sm:$0xff]   ;;  %v1996_v21 = vld [vmem:[#allocation7 + $0x78] sm:$0xff]  }
  0x85   :  { %540 = vmatprep.subr.bf16.mxu1 %v1998_v13  ;;  %v2004_v15 = vld [vmem:[#allocation9 + $0x24] ss:$16 sps:$4 sm:$0xff]   ;;  %v2009_v18 = vld [vmem:[#allocation9 + $0x20] ss:$16 sps:$4 sm:$0xff]   ;;  %v1997_v24 = vld [vmem:[#allocation7 + $0x38] sm:$0xff]  }
  0x86   :  { %1932 = vmatpush3.bf16.msra.mxu0 %v1985_v5  ;;  %541 = vmatpush1.bf16.msra.mxu1 %v2003_v14  ;;  %v2010_v19 = vld [vmem:[#allocation9 + $0x44] ss:$16 sps:$4 sm:$0xff]   ;;  %v2015_v22 = vld [vmem:[#allocation9 + $0x40] ss:$16 sps:$4 sm:$0xff]   ;;  %v2002_v26 = vld [vmem:[#allocation9 + $0xc] ss:$16 sps:$4 sm:$0xff]  }
  0x87   :  { %1933 = vmatprep.subr.bf16.mxu0 %v1986_v6  ;;  %542 = vmatprep.subr.bf16.mxu1 %v2004_v15  ;;  %v1995_v20 = vld [vmem:[#allocation7 + $0x30] sm:$0xff]   ;;  %v2000_v37 = vld [vmem:[#allocation9 + $0x8] ss:$16 sps:$4 sm:$0xff]   ;;  %v2008_v38 = vld [vmem:[#allocation9 + $0x2c] ss:$16 sps:$4 sm:$0xff]  }
  0x88   :  { %v2016_v23 = vld [vmem:[#allocation9 + $0x64] ss:$16 sps:$4 sm:$0xff]   ;;  %v2021_v25 = vld [vmem:[#allocation9 + $0x60] ss:$16 sps:$4 sm:$0xff]   ;;  %v2006_v40 = vld [vmem:[#allocation9 + $0x28] ss:$16 sps:$4 sm:$0xff]  }
  0x89   :  { %v2022_v27 = vld [vmem:[#allocation9 + $0x84] ss:$16 sps:$4 sm:$0xff]   ;;  %v2027_v28 = vld [vmem:[#allocation9 + $0x80] ss:$16 sps:$4 sm:$0xff]   ;;  %v2014_v41 = vld [vmem:[#allocation9 + $0x4c] ss:$16 sps:$4 sm:$0xff]  }
  0x8a   :  { %1934 = vmatpush3.bf16.msra.mxu0 %v1987_v7  ;;  %543 = vmatpush1.bf16.msra.mxu1 %v2009_v18  ;;  %v2028_v29 = vld [vmem:[#allocation9 + $0xa4] ss:$16 sps:$4 sm:$0xff]   ;;  %v2033_v30 = vld [vmem:[#allocation9 + $0xa0] ss:$16 sps:$4 sm:$0xff]   ;;  %v2012_v42 = vld [vmem:[#allocation9 + $0x48] ss:$16 sps:$4 sm:$0xff]  }
  0x8b   :  { %1935 = vmatprep.subr.bf16.mxu0 %v1988_v8  ;;  %544 = vmatprep.subr.bf16.mxu1 %v2010_v19  ;;  %v2034_v31 = vld [vmem:[#allocation9 + $0xc4] ss:$16 sps:$4 sm:$0xff]   ;;  %v2039_v32 = vld [vmem:[#allocation9 + $0xc0] ss:$16 sps:$4 sm:$0xff]   ;;  %v2020_v43 = vld [vmem:[#allocation9 + $0x6c] ss:$16 sps:$4 sm:$0xff]  }
  0x8c   :  { %v2018_v44 = vld [vmem:[#allocation9 + $0x68] ss:$16 sps:$4 sm:$0xff]   ;;  %v2026_v45 = vld [vmem:[#allocation9 + $0x8c] ss:$16 sps:$4 sm:$0xff]   ;;  %v2040_v51 = vld [vmem:[#allocation9 + $0xe4] ss:$16 sps:$4 sm:$0xff]  }
  0x8d   :  { %v2024_v46 = vld [vmem:[#allocation9 + $0x88] ss:$16 sps:$4 sm:$0xff]   ;;  %v2032_v47 = vld [vmem:[#allocation9 + $0xac] ss:$16 sps:$4 sm:$0xff]   ;;  %v2045_v54 = vld [vmem:[#allocation9 + $0xe0] ss:$16 sps:$4 sm:$0xff]  }
  0x8e   :  { %1936 = vmatpush3.bf16.msra.mxu0 %v1989_v9  ;;  %545 = vmatpush1.bf16.msra.mxu1 %v2015_v22  ;;  %v2030_v48 = vld [vmem:[#allocation9 + $0xa8] ss:$16 sps:$4 sm:$0xff]   ;;  %v2038_v49 = vld [vmem:[#allocation9 + $0xcc] ss:$16 sps:$4 sm:$0xff]   ;;  %v2048_v55 = vld [vmem:[#allocation10 + $0x4] ss:$16 sps:$4 sm:$0xff]  }
  0x8f   :  { %1937 = vmatprep.subr.bf16.mxu0 %v1990_v10  ;;  %546 = vmatprep.subr.bf16.mxu1 %v2016_v23  ;;  %v2036_v50 = vld [vmem:[#allocation9 + $0xc8] ss:$16 sps:$4 sm:$0xff]   ;;  %v2044_v52 = vld [vmem:[#allocation9 + $0xec] ss:$16 sps:$4 sm:$0xff]   ;;  %v2046_v62 = vld [vmem:[#allocation10] ss:$16 sps:$4 sm:$0xff]  }
  0x90   :  { %v2042_v53 = vld [vmem:[#allocation9 + $0xe8] ss:$16 sps:$4 sm:$0xff]   ;;  %v2051_v56 = vld [vmem:[#allocation10 + $0xc] ss:$16 sps:$4 sm:$0xff]   ;;  %v2054_v2 = vld [vmem:[#allocation10 + $0x24] ss:$16 sps:$4 sm:$0xff]  }
  0x91   :  { %v2049_v63 = vld [vmem:[#allocation10 + $0x8] ss:$16 sps:$4 sm:$0xff]   ;;  %v2057_v3 = vld [vmem:[#allocation10 + $0x2c] ss:$16 sps:$4 sm:$0xff]   ;;  %v2052_v4 = vld [vmem:[#allocation10 + $0x20] ss:$16 sps:$4 sm:$0xff]  }
  0x92   :  { %1938 = vmatpush3.bf16.msra.mxu0 %v1991_v11  ;;  %547 = vmatpush1.bf16.msra.mxu1 %v2021_v25  ;;  %v2055_v5 = vld [vmem:[#allocation10 + $0x28] ss:$16 sps:$4 sm:$0xff]   ;;  %v2060_v6 = vld [vmem:[#allocation10 + $0x44] ss:$16 sps:$4 sm:$0xff]   ;;  %v2063_v7 = vld [vmem:[#allocation10 + $0x4c] ss:$16 sps:$4 sm:$0xff]  }
  0x93   :  { %1939 = vmatprep.subr.bf16.mxu0 %v1992_v12  ;;  %548 = vmatprep.subr.bf16.mxu1 %v2022_v27  ;;  %v2058_v8 = vld [vmem:[#allocation10 + $0x40] ss:$16 sps:$4 sm:$0xff]   ;;  %v2061_v9 = vld [vmem:[#allocation10 + $0x48] ss:$16 sps:$4 sm:$0xff]   ;;  %v2066_v10 = vld [vmem:[#allocation10 + $0x64] ss:$16 sps:$4 sm:$0xff]  }
  0x94   :  { %v2069_v11 = vld [vmem:[#allocation10 + $0x6c] ss:$16 sps:$4 sm:$0xff]   ;;  %v2064_v12 = vld [vmem:[#allocation10 + $0x60] ss:$16 sps:$4 sm:$0xff]   ;;  %v2067_v13 = vld [vmem:[#allocation10 + $0x68] ss:$16 sps:$4 sm:$0xff]  }
  0x95   :  { %v2072_v14 = vld [vmem:[#allocation10 + $0x84] ss:$16 sps:$4 sm:$0xff]   ;;  %v2075_v15 = vld [vmem:[#allocation10 + $0x8c] ss:$16 sps:$4 sm:$0xff]   ;;  %v2085_v25 = vld [vmem:[#allocation10 + $0xc8] ss:$16 sps:$4 sm:$0xff]  }
  0x96   :  { %1940 = vmatpush3.bf16.msra.mxu0 %v1993_v16  ;;  %549 = vmatpush1.bf16.msra.mxu1 %v2027_v28  ;;  %v2070_v16 = vld [vmem:[#allocation10 + $0x80] ss:$16 sps:$4 sm:$0xff]   ;;  %v2078_v18 = vld [vmem:[#allocation10 + $0xa4] ss:$16 sps:$4 sm:$0xff]   ;;  %v2081_v19 = vld [vmem:[#allocation10 + $0xac] ss:$16 sps:$4 sm:$0xff]  }
  0x97   :  { %1941 = vmatprep.subr.bf16.mxu0 %v1994_v17  ;;  %550 = vmatprep.subr.bf16.mxu1 %v2028_v29  ;;  %v2073_v17 = vld [vmem:[#allocation10 + $0x88] ss:$16 sps:$4 sm:$0xff]   ;;  %v2084_v22 = vld [vmem:[#allocation10 + $0xc4] ss:$16 sps:$4 sm:$0xff]   ;;  %v2087_v23 = vld [vmem:[#allocation10 + $0xcc] ss:$16 sps:$4 sm:$0xff]  }
  0x98   :  { %v2093_v27 = vld [vmem:[#allocation10 + $0xec] ss:$16 sps:$4 sm:$0xff]   ;;  %v2088_v28 = vld [vmem:[#allocation10 + $0xe0] ss:$16 sps:$4 sm:$0xff]   ;;  %v2091_v29 = vld [vmem:[#allocation10 + $0xe8] ss:$16 sps:$4 sm:$0xff]  }
  0x9a   :  { %1942 = vmatpush3.bf16.msra.mxu0 %v1995_v20  ;;  %551 = vmatpush1.bf16.msra.mxu1 %v2033_v30  ;;  %v2076_v20 = vld [vmem:[#allocation10 + $0xa0] ss:$16 sps:$4 sm:$0xff]  }
  0x9b   :  { %1943 = vmatprep.subr.bf16.mxu0 %v1996_v21  ;;  %552 = vmatprep.subr.bf16.mxu1 %v2034_v31  ;;  %v2079_v21 = vld [vmem:[#allocation10 + $0xa8] ss:$16 sps:$4 sm:$0xff]   ;;  %v626_v30 = vld [vmem:[%s2777_s1] sm:$0xff] }
  0x9c   :  { %v2096_v31 = vld [vmem:[#allocation13 + $0x4] ss:$16 sps:$4 sm:$0xff]  }
  0x9e   :  { %1944 = vmatpush3.bf16.msra.mxu0 %v1997_v24  ;;  %553 = vmatpush1.bf16.msra.mxu1 %v2039_v32  ;;  %v2082_v24 = vld [vmem:[#allocation10 + $0xc0] ss:$16 sps:$4 sm:$0xff]   ;;  %v2099_v32 = vld [vmem:[#allocation13 + $0xc] ss:$16 sps:$4 sm:$0xff]  }
  0x9f   :  { %581 = vmatprep.subr.bf16.mxu0 %v2002_v26  ;;  %554 = vmatprep.subr.bf16.mxu1 %v2040_v51  ;;  %v2090_v26 = vld [vmem:[#allocation10 + $0xe4] ss:$16 sps:$4 sm:$0xff]   ;;  %v2123_v51 = vld [vmem:[#allocation13 + $0x8c] ss:$16 sps:$4 sm:$0xff]  }
  0xa2   :  { %555 = vmatpush1.bf16.msra.mxu1 %v2045_v54  ;;  %v2124_v54 = vld [vmem:[#allocation13 + $0xa0] ss:$16 sps:$4 sm:$0xff]  }
  0xa3   :  { %841 = vmatprep.subr.bf16.mxu1 %v2048_v55  ;;  %v2129_v55 = vld [vmem:[#allocation13 + $0xac] ss:$16 sps:$4 sm:$0xff]  }
 0x100   :  { %v148_v36 = vpop.permute.xlu0 %147 }
 0x101   :  { %vm149_vm0 = vcmp.eq.s32.totalorder %v148_v36, %v144_v34  ;;  %vm150_vm1 = vcmp.eq.s32.totalorder %v148_v36, %v145_v35  ;;  %v648_v34 = vpack.c.bf16 %v626_v30, %v626_v30  ;;  %v2094_v35 = vld [vmem:[#allocation13] ss:$16 sps:$4 sm:$0xff]   ;;  %v2097_v36 = vld [vmem:[#allocation13 + $0x8] ss:$16 sps:$4 sm:$0xff]  }
 0x102   :  { %vm1777_vm2 = vmpackc.low %vm149_vm0, %vm149_vm0  ;;  %v2178_v30 = vld [vmem:[#allocation12 + $0xc0] ss:$16 sps:$4 sm:$0xff]  }
 0x103   :  { %vm1775_vm3 = vmpackc.low %vm150_vm1, %vm150_vm1 }
 0x104   :  { %1776 = vmatprep.mubr.msk.bf16.mxu0 %vm1775_vm3, %v2492_v39 }
 0x105   :  { %1778 = vmatmul.mubr.msk.bf16.vlgmr.msra.gmra.mrb[0].mxu0 %vm1777_vm2, %v2492_v39  ;;  %v2100_v39 = vld [vmem:[#allocation13 + $0x20] ss:$16 sps:$4 sm:$0xff]  }
 0x106   :  { %582 = vmatpush1.bf16.msra.mxu0 %v2000_v37  ;;  %613 = vmatprep.mubr.bf16.mxu0 %v2491_v0  ;;  %v2102_v37 = vld [vmem:[#allocation13 + $0x24] ss:$16 sps:$4 sm:$0xff]  }
 0x107   :  { %583 = vmatprep.subr.bf16.mxu0 %v2008_v38  ;;  %v2105_v38 = vld [vmem:[#allocation13 + $0x2c] ss:$16 sps:$4 sm:$0xff]  }
 0x10a   :  { %584 = vmatpush1.bf16.msra.mxu0 %v2006_v40  ;;  %v2103_v40 = vld [vmem:[#allocation13 + $0x28] ss:$16 sps:$4 sm:$0xff]  }
 0x10b   :  { %585 = vmatprep.subr.bf16.mxu0 %v2014_v41  ;;  %v2108_v41 = vld [vmem:[#allocation13 + $0x44] ss:$16 sps:$4 sm:$0xff]  }
 0x10e   :  { %586 = vmatpush1.bf16.msra.mxu0 %v2012_v42  ;;  %v2111_v42 = vld [vmem:[#allocation13 + $0x4c] ss:$16 sps:$4 sm:$0xff]  }
 0x10f   :  { %587 = vmatprep.subr.bf16.mxu0 %v2020_v43  ;;  %v2106_v43 = vld [vmem:[#allocation13 + $0x40] ss:$16 sps:$4 sm:$0xff]  }
 0x112   :  { %588 = vmatpush1.bf16.msra.mxu0 %v2018_v44  ;;  %v2109_v44 = vld [vmem:[#allocation13 + $0x48] ss:$16 sps:$4 sm:$0xff]  }
 0x113   :  { %589 = vmatprep.subr.bf16.mxu0 %v2026_v45  ;;  %v2114_v45 = vld [vmem:[#allocation13 + $0x64] ss:$16 sps:$4 sm:$0xff]  }
 0x116   :  { %590 = vmatpush1.bf16.msra.mxu0 %v2024_v46  ;;  %v2117_v46 = vld [vmem:[#allocation13 + $0x6c] ss:$16 sps:$4 sm:$0xff]  }
 0x117   :  { %591 = vmatprep.subr.bf16.mxu0 %v2032_v47  ;;  %v2112_v47 = vld [vmem:[#allocation13 + $0x60] ss:$16 sps:$4 sm:$0xff]  }
 0x11a   :  { %592 = vmatpush1.bf16.msra.mxu0 %v2030_v48  ;;  %v2115_v48 = vld [vmem:[#allocation13 + $0x68] ss:$16 sps:$4 sm:$0xff]  }
 0x11b   :  { %593 = vmatprep.subr.bf16.mxu0 %v2038_v49  ;;  %v2120_v49 = vld [vmem:[#allocation13 + $0x84] ss:$16 sps:$4 sm:$0xff]  }
 0x11e   :  { %594 = vmatpush1.bf16.msra.mxu0 %v2036_v50  ;;  %v2118_v50 = vld [vmem:[#allocation13 + $0x80] ss:$16 sps:$4 sm:$0xff]  }
 0x11f   :  { %595 = vmatprep.subr.bf16.mxu0 %v2044_v52  ;;  %v2121_v52 = vld [vmem:[#allocation13 + $0x88] ss:$16 sps:$4 sm:$0xff]  }
 0x122   :  { %596 = vmatpush1.bf16.msra.mxu0 %v2042_v53  ;;  %v2126_v53 = vld [vmem:[#allocation13 + $0xa4] ss:$16 sps:$4 sm:$0xff]  }
 0x123   :  { %882 = vmatprep.subr.bf16.mxu0 %v2051_v56  ;;  %v2127_v56 = vld [vmem:[#allocation13 + $0xa8] ss:$16 sps:$4 sm:$0xff]  }
 0x1d8   :  { %v1945_v57 = vpop.f32.mrb[0].mxu0 }
 0x1d9   :  { %v1946_v58 = vpop.f32.mrb[1].mxu0 }
 0x1da   :  { %v1947_v59 = vadd.f32 %v1946_v58, %v1945_v57  ;;  %v1948_v60 = vpop.f32.mrb[2].mxu0  ;;  %v2132_v57 = vld [vmem:[#allocation13 + $0xc4] ss:$16 sps:$4 sm:$0xff]   ;;  %v2130_v58 = vld [vmem:[#allocation13 + $0xc0] ss:$16 sps:$4 sm:$0xff]  }
 0x1db   :  { %v1949_v61 = vpop.f32.mrb[3].mxu0  ;;  %v2133_v60 = vld [vmem:[#allocation13 + $0xc8] ss:$16 sps:$4 sm:$0xff]  }
 0x1dc   :  { %v325_v1 = vpack.c.bf16 %v1947_v59, %v1947_v59  ;;  %v2135_v59 = vld [vmem:[#allocation13 + $0xcc] ss:$16 sps:$4 sm:$0xff]   ;;  %v2138_v61 = vld [vmem:[#allocation13 + $0xe4] ss:$16 sps:$4 sm:$0xff]  }
 0x1de   :  { %573 = vmatmul.mubr.bf16.vlgmr.msra.gmra.mrb[0].mxu1 %v325_v1  ;;  %614 = vmatmul.mubr.bf16.vlgmr.msra.gmra.mrb[4].mxu0 %v325_v1  ;;  %v2139_v1 = vld [vmem:[#allocation13 + $0xe8] ss:$16 sps:$4 sm:$0xff]  }
 0x1df   :  { %842 = vmatpush1.bf16.msra.mxu1 %v2046_v62  ;;  %883 = vmatpush1.bf16.msra.mxu0 %v2049_v63  ;;  %v2136_v62 = vld [vmem:[#allocation13 + $0xe0] ss:$16 sps:$4 sm:$0xff]   ;;  %v2141_v63 = vld [vmem:[#allocation13 + $0xec] ss:$16 sps:$4 sm:$0xff]  }
 0x1e0   :  { %843 = vmatprep.subr.bf16.mxu1 %v2054_v2  ;;  %884 = vmatprep.subr.bf16.mxu0 %v2057_v3  ;;  %v627_v2 = vld [vmem:[%s2777_s1 + $0x8] sm:$0xff] }
 0x1e1   :  { %873 = vmatprep.mubr.bf16.mxu1 %v2491_v0  ;;  %914 = vmatprep.mubr.bf16.mxu0 %v2491_v0  ;;  %v984_v3 = vpack.c.bf16 %v627_v2, %v627_v2 }
 0x1e3   :  { %844 = vmatpush1.bf16.msra.mxu1 %v2052_v4  ;;  %885 = vmatpush1.bf16.msra.mxu0 %v2055_v5  ;;  %v2144_v4 = vld [vmem:[#allocation12 + $0x4] ss:$16 sps:$4 sm:$0xff]   ;;  %v2147_v5 = vld [vmem:[#allocation12 + $0xc] ss:$16 sps:$4 sm:$0xff]  }
 0x1e4   :  { %845 = vmatprep.subr.bf16.mxu1 %v2060_v6  ;;  %886 = vmatprep.subr.bf16.mxu0 %v2063_v7  ;;  %v2142_v6 = vld [vmem:[#allocation12] ss:$16 sps:$4 sm:$0xff]   ;;  %v2145_v7 = vld [vmem:[#allocation12 + $0x8] ss:$16 sps:$4 sm:$0xff]  }
 0x1e7   :  { %846 = vmatpush1.bf16.msra.mxu1 %v2058_v8  ;;  %887 = vmatpush1.bf16.msra.mxu0 %v2061_v9  ;;  %v2150_v8 = vld [vmem:[#allocation12 + $0x24] ss:$16 sps:$4 sm:$0xff]   ;;  %v2153_v9 = vld [vmem:[#allocation12 + $0x2c] ss:$16 sps:$4 sm:$0xff]  }
 0x1e8   :  { %847 = vmatprep.subr.bf16.mxu1 %v2066_v10  ;;  %888 = vmatprep.subr.bf16.mxu0 %v2069_v11  ;;  %v2148_v10 = vld [vmem:[#allocation12 + $0x20] ss:$16 sps:$4 sm:$0xff]   ;;  %v2151_v11 = vld [vmem:[#allocation12 + $0x28] ss:$16 sps:$4 sm:$0xff]  }
 0x1eb   :  { %848 = vmatpush1.bf16.msra.mxu1 %v2064_v12  ;;  %889 = vmatpush1.bf16.msra.mxu0 %v2067_v13  ;;  %v2156_v12 = vld [vmem:[#allocation12 + $0x44] ss:$16 sps:$4 sm:$0xff]   ;;  %v2159_v13 = vld [vmem:[#allocation12 + $0x4c] ss:$16 sps:$4 sm:$0xff]  }
 0x1ec   :  { %849 = vmatprep.subr.bf16.mxu1 %v2072_v14  ;;  %890 = vmatprep.subr.bf16.mxu0 %v2075_v15  ;;  %v2154_v14 = vld [vmem:[#allocation12 + $0x40] ss:$16 sps:$4 sm:$0xff]   ;;  %v2157_v15 = vld [vmem:[#allocation12 + $0x48] ss:$16 sps:$4 sm:$0xff]  }
 0x1ef   :  { %850 = vmatpush1.bf16.msra.mxu1 %v2070_v16  ;;  %891 = vmatpush1.bf16.msra.mxu0 %v2073_v17  ;;  %v2162_v16 = vld [vmem:[#allocation12 + $0x64] ss:$16 sps:$4 sm:$0xff]   ;;  %v2165_v17 = vld [vmem:[#allocation12 + $0x6c] ss:$16 sps:$4 sm:$0xff]  }
 0x1f0   :  { %851 = vmatprep.subr.bf16.mxu1 %v2078_v18  ;;  %892 = vmatprep.subr.bf16.mxu0 %v2081_v19  ;;  %v2160_v18 = vld [vmem:[#allocation12 + $0x60] ss:$16 sps:$4 sm:$0xff]   ;;  %v2163_v19 = vld [vmem:[#allocation12 + $0x68] ss:$16 sps:$4 sm:$0xff]  }
 0x1f3   :  { %852 = vmatpush1.bf16.msra.mxu1 %v2076_v20  ;;  %893 = vmatpush1.bf16.msra.mxu0 %v2079_v21  ;;  %v2168_v20 = vld [vmem:[#allocation12 + $0x84] ss:$16 sps:$4 sm:$0xff]   ;;  %v2171_v21 = vld [vmem:[#allocation12 + $0x8c] ss:$16 sps:$4 sm:$0xff]  }
 0x1f4   :  { %853 = vmatprep.subr.bf16.mxu1 %v2084_v22  ;;  %894 = vmatprep.subr.bf16.mxu0 %v2087_v23  ;;  %v2166_v22 = vld [vmem:[#allocation12 + $0x80] ss:$16 sps:$4 sm:$0xff]   ;;  %v2169_v23 = vld [vmem:[#allocation12 + $0x88] ss:$16 sps:$4 sm:$0xff]  }
 0x1f7   :  { %854 = vmatpush1.bf16.msra.mxu1 %v2082_v24  ;;  %895 = vmatpush1.bf16.msra.mxu0 %v2085_v25  ;;  %v2174_v24 = vld [vmem:[#allocation12 + $0xa4] ss:$16 sps:$4 sm:$0xff]   ;;  %v2172_v25 = vld [vmem:[#allocation12 + $0xa0] ss:$16 sps:$4 sm:$0xff]  }
 0x1f8   :  { %855 = vmatprep.subr.bf16.mxu1 %v2090_v26  ;;  %896 = vmatprep.subr.bf16.mxu0 %v2093_v27  ;;  %v2177_v26 = vld [vmem:[#allocation12 + $0xac] ss:$16 sps:$4 sm:$0xff]   ;;  %v2175_v27 = vld [vmem:[#allocation12 + $0xa8] ss:$16 sps:$4 sm:$0xff]  }
 0x1fb   :  { %856 = vmatpush1.bf16.msra.mxu1 %v2088_v28  ;;  %897 = vmatpush1.bf16.msra.mxu0 %v2091_v29  ;;  %v2180_v28 = vld [vmem:[#allocation12 + $0xc4] ss:$16 sps:$4 sm:$0xff]   ;;  %v2183_v29 = vld [vmem:[#allocation12 + $0xcc] ss:$16 sps:$4 sm:$0xff]  }
 0x1fc   :  { %1177 = vmatprep.subr.bf16.mxu1 %v2096_v31  ;;  %1218 = vmatprep.subr.bf16.mxu0 %v2099_v32  ;;  %v2181_v31 = vld [vmem:[#allocation12 + $0xc8] ss:$16 sps:$4 sm:$0xff]   ;;  %v2186_v32 = vld [vmem:[#allocation12 + $0xe4] ss:$16 sps:$4 sm:$0xff]  }
 0x1fe   :  { %874 = vmatmul.mubr.bf16.vlgmr.msra.gmra.mrb[0].mxu1 %v648_v34  ;;  %915 = vmatmul.mubr.bf16.vlgmr.msra.gmra.mrb[4].mxu0 %v648_v34  ;;  %v2189_v34 = vld [vmem:[#allocation12 + $0xec] ss:$16 sps:$4 sm:$0xff]  }
 0x1ff   :  { %1178 = vmatpush1.bf16.msra.mxu1 %v2094_v35  ;;  %1219 = vmatpush1.bf16.msra.mxu0 %v2097_v36  ;;  %v2184_v35 = vld [vmem:[#allocation12 + $0xe0] ss:$16 sps:$4 sm:$0xff]   ;;  %v2187_v36 = vld [vmem:[#allocation12 + $0xe8] ss:$16 sps:$4 sm:$0xff]  }
 0x200   :  { %1179 = vmatprep.subr.bf16.mxu1 %v2102_v37  ;;  %1220 = vmatprep.subr.bf16.mxu0 %v2105_v38  ;;  %v2700_v37 = vshrl.u32 %v143_v33, 7 }
 0x201   :  { %1209 = vmatprep.mubr.bf16.mxu1 %v2491_v0  ;;  %1250 = vmatprep.mubr.bf16.mxu0 %v2491_v0 }
 0x202   :  { %v2703_v38 = vsub.s32 0, %v2700_v37 }
 0x203   :  { %1180 = vmatpush1.bf16.msra.mxu1 %v2100_v39  ;;  %1221 = vmatpush1.bf16.msra.mxu0 %v2103_v40  ;;  %v358_v39 = vld [vmem:[%s2782_s6] sm:$0xf]  ;;  %v2709_v40 = vsub.s32 1, %v2700_v37 }
 0x204   :  { %1181 = vmatprep.subr.bf16.mxu1 %v2108_v41  ;;  %1222 = vmatprep.subr.bf16.mxu0 %v2111_v42  ;;  %v363_v41 = vrot.slane %v358_v39, %v2703_v38 }
 0x205   :  { %v367_v42 = vrot.slane %v358_v39, %v2709_v40 }
 0x207   :  { %1182 = vmatpush1.bf16.msra.mxu1 %v2106_v43  ;;  %1223 = vmatpush1.bf16.msra.mxu0 %v2109_v44 }
 0x208   :  { %1183 = vmatprep.subr.bf16.mxu1 %v2114_v45  ;;  %1224 = vmatprep.subr.bf16.mxu0 %v2117_v46  ;;  %v374_v45 = vsub.s32 3, %v2700_v37 }
 0x20b   :  { %1184 = vmatpush1.bf16.msra.mxu1 %v2112_v47  ;;  %1225 = vmatpush1.bf16.msra.mxu0 %v2115_v48 }
 0x20c   :  { %1185 = vmatprep.subr.bf16.mxu1 %v2120_v49  ;;  %1226 = vmatprep.subr.bf16.mxu0 %v2123_v51 }
 0x20f   :  { %1186 = vmatpush1.bf16.msra.mxu1 %v2118_v50  ;;  %1227 = vmatpush1.bf16.msra.mxu0 %v2121_v52 }
 0x210   :  { %1187 = vmatprep.subr.bf16.mxu1 %v2126_v53  ;;  %1228 = vmatprep.subr.bf16.mxu0 %v2129_v55  ;;  %v375_v55 = vrot.slane %v358_v39, %v374_v45 }
 0x213   :  { %1188 = vmatpush1.bf16.msra.mxu1 %v2124_v54  ;;  %1229 = vmatpush1.bf16.msra.mxu0 %v2127_v56  ;;  %v370_v56 = vsub.s32 2, %v2700_v37 }
 0x214   :  { %1189 = vmatprep.subr.bf16.mxu1 %v2132_v57  ;;  %1230 = vmatprep.subr.bf16.mxu0 %v2135_v59 }
 0x217   :  { %1190 = vmatpush1.bf16.msra.mxu1 %v2130_v58  ;;  %1231 = vmatpush1.bf16.msra.mxu0 %v2133_v60  ;;  %v371_v58 = vrot.slane %v358_v39, %v370_v56  ;;  %v2213_v39 = vld [vmem:[#allocation15 + $0x74] ss:$8 sps:$4 sm:$0xff]  }
 0x218   :  { %1191 = vmatprep.subr.bf16.mxu1 %v2138_v61  ;;  %1232 = vmatprep.subr.bf16.mxu0 %v2141_v63 }
 0x21b   :  { %1192 = vmatpush1.bf16.msra.mxu1 %v2136_v62  ;;  %1233 = vmatpush1.bf16.msra.mxu0 %v2139_v1 }
 0x21c   :  { %1419 = vmatprep.subr.bf16.mxu1 %v2144_v4  ;;  %1460 = vmatprep.subr.bf16.mxu0 %v2147_v5  ;;  %v630_v4 = vld [vmem:[#allocation4] sm:$0xff] }
 0x21e   :  { %1210 = vmatmul.mubr.bf16.vlgmr.msra.gmra.mrb[4].mxu1 %v984_v3  ;;  %1251 = vmatmul.mubr.bf16.vlgmr.msra.gmra.mrb[8].mxu0 %v984_v3 }
 0x21f   :  { %1451 = vmatprep.mubr.bf16.mxu1 %v2491_v0  ;;  %1420 = vmatpush1.bf16.msra.mxu1 %v2142_v6 }
 0x220   :  { %1461 = vmatpush1.bf16.msra.mxu0 %v2145_v7  ;;  %1492 = vmatprep.mubr.bf16.mxu0 %v2491_v0 }
 0x221   :  { %1421 = vmatprep.subr.bf16.mxu1 %v2150_v8  ;;  %1462 = vmatprep.subr.bf16.mxu0 %v2153_v9 }
 0x223   :  { %1422 = vmatpush1.bf16.msra.mxu1 %v2148_v10 }
 0x224   :  { %1463 = vmatpush1.bf16.msra.mxu0 %v2151_v11  ;;  %1423 = vmatprep.subr.bf16.mxu1 %v2156_v12 }
 0x225   :  { %1464 = vmatprep.subr.bf16.mxu0 %v2159_v13 }
 0x227   :  { %1424 = vmatpush1.bf16.msra.mxu1 %v2154_v14 }
 0x228   :  { %1465 = vmatpush1.bf16.msra.mxu0 %v2157_v15  ;;  %1425 = vmatprep.subr.bf16.mxu1 %v2162_v16 }
 0x229   :  { %1466 = vmatprep.subr.bf16.mxu0 %v2165_v17 }
 0x22b   :  { %1426 = vmatpush1.bf16.msra.mxu1 %v2160_v18 }
 0x22c   :  { %1467 = vmatpush1.bf16.msra.mxu0 %v2163_v19  ;;  %1427 = vmatprep.subr.bf16.mxu1 %v2168_v20 }
 0x22d   :  { %1468 = vmatprep.subr.bf16.mxu0 %v2171_v21 }
 0x22f   :  { %1428 = vmatpush1.bf16.msra.mxu1 %v2166_v22 }
 0x230   :  { %1469 = vmatpush1.bf16.msra.mxu0 %v2169_v23  ;;  %1429 = vmatprep.subr.bf16.mxu1 %v2174_v24  ;;  %v2192_v23 = vld [vmem:[#allocation15 + $0x4] ss:$8 sps:$4 sm:$0xff]   ;;  %v2190_v24 = vld [vmem:[#allocation15] ss:$8 sps:$4 sm:$0xff]  }
 0x231   :  { %1470 = vmatprep.subr.bf16.mxu0 %v2177_v26  ;;  %v2193_v26 = vld [vmem:[#allocation15 + $0x10] ss:$8 sps:$4 sm:$0xff]  }
 0x233   :  { %1430 = vmatpush1.bf16.msra.mxu1 %v2172_v25  ;;  %v2195_v25 = vld [vmem:[#allocation15 + $0x14] ss:$8 sps:$4 sm:$0xff]  }
 0x234   :  { %1471 = vmatpush1.bf16.msra.mxu0 %v2175_v27  ;;  %1431 = vmatprep.subr.bf16.mxu1 %v2180_v28  ;;  %v2198_v27 = vld [vmem:[#allocation15 + $0x24] ss:$8 sps:$4 sm:$0xff]   ;;  %v2196_v28 = vld [vmem:[#allocation15 + $0x20] ss:$8 sps:$4 sm:$0xff]  }
 0x235   :  { %1472 = vmatprep.subr.bf16.mxu0 %v2183_v29  ;;  %v2199_v29 = vld [vmem:[#allocation15 + $0x30] ss:$8 sps:$4 sm:$0xff]  }
 0x237   :  { %1432 = vmatpush1.bf16.msra.mxu1 %v2178_v30  ;;  %v2204_v30 = vld [vmem:[#allocation15 + $0x44] ss:$8 sps:$4 sm:$0xff]  }
 0x238   :  { %1473 = vmatpush1.bf16.msra.mxu0 %v2181_v31  ;;  %1433 = vmatprep.subr.bf16.mxu1 %v2186_v32  ;;  %v2202_v31 = vld [vmem:[#allocation15 + $0x40] ss:$8 sps:$4 sm:$0xff]   ;;  %v2207_v32 = vld [vmem:[#allocation15 + $0x54] ss:$8 sps:$4 sm:$0xff]  }
 0x239   :  { %1474 = vmatprep.subr.bf16.mxu0 %v2189_v34  ;;  %v2205_v34 = vld [vmem:[#allocation15 + $0x50] ss:$8 sps:$4 sm:$0xff]  }
 0x23b   :  { %1434 = vmatpush1.bf16.msra.mxu1 %v2184_v35  ;;  %v2210_v35 = vld [vmem:[#allocation15 + $0x64] ss:$8 sps:$4 sm:$0xff]  }
 0x23c   :  { %1475 = vmatpush1.bf16.msra.mxu0 %v2187_v36  ;;  %1665 = vmatprep.subr.bf16.mxu1 %v2192_v23  ;;  %v2208_v36 = vld [vmem:[#allocation15 + $0x60] ss:$8 sps:$4 sm:$0xff]  }
 0x2d1   :  { %v875_v43 = vpop.f32.mrb[0].mxu1  ;;  %v916_v44 = vpop.f32.mrb[4].mxu0 }
 0x2d2   :  { %v1951_v33 = vadd.f32 %v875_v43, %v363_v41  ;;  %v877_v46 = vpop.f32.mrb[1].mxu1  ;;  %v918_v47 = vpop.f32.mrb[5].mxu0  ;;  %v1953_v60 = vadd.f32 %v916_v44, %v371_v58  ;;  %v2211_v41 = vld [vmem:[#allocation15 + $0x70] ss:$8 sps:$4 sm:$0xff]  }
 0x2d3   :  { %v1952_v48 = vadd.f32 %v877_v46, %v367_v42  ;;  %v879_v49 = vpop.f32.mrb[2].mxu1  ;;  %v920_v50 = vpop.f32.mrb[6].mxu0  ;;  %v1954_v57 = vadd.f32 %v918_v47, %v375_v55  ;;  %v634_v42 = vld [vmem:[%s2785_s9] sm:$0xf]  ;;  %s2493_s9 = smov [#allocation17]  }
 0x2d4   :  { %v1843_v51 = vmul.f32 -1.442695, %v1951_v33  ;;  %v880_v52 = vpop.f32.mrb[3].mxu1  ;;  %v921_v53 = vpop.f32.mrb[7].mxu0  ;;  %v1505_v43 = vrot.slane %v634_v42, %v2703_v38  ;;  %v1509_v46 = vrot.slane %v634_v42, %v2709_v40  ;;  %s1723_s4 = sshll.u32 %s2493_s9, 4  ;;  %s1724_s4 = int_to_ptr.vmem [resolvable:$true] %s1723_s4 }
 0x2d5   :  { %v1844_v54 = vmul.f32 -1.442695, %v1952_v48  ;;  %v1845_v59 = vmul.f32 -1.442695, %v1954_v57  ;;  %s2400_s5 = scalar_lea.vmem %s1724_s4, 256  ;;  %p2405_p1 = scmp.lt.s32.totalorder %s1724_s4, %s1724_s4 }
 0x2d6   :  { %2214 = vpow2.f32 %v1843_v51  ;;  %p2401_p0 = scmp.ne.s32.totalorder %s1724_s4, %s2400_s5  ;;  %p2406_p2 = scmp.lt.s32.totalorder %s2400_s5, %s2400_s5 }
 0x2d7   :  { %2216 = vpow2.f32 %v1844_v54 }
 0x2d8   :  { %2218 = vpow2.f32 %v1845_v59  ;;  %p2407_p3 = por %p2406_p2, %p2405_p1 }
 0x2d9   :  { %2220 = vtanh.f32 %v1953_v60 }
 0x2da   :  { %p2408_p4 = pnand %p2407_p3, %p2401_p0 }
 0x2e0   :  { %v2215_v61 = vpop.eup %2214 }
 0x2e1   :  { %v2217_v62 = vpop.eup %2216  ;;  %v930_v63 = vadd.f32 1.0, %v2215_v61 }
 0x2e2   :  { %v936_v1 = vadd.f32 1.0, %v2217_v62  ;;  %v2219_v2 = vpop.eup %2218  ;;  %v1517_v62 = vrot.slane %v634_v42, %v374_v45 }
 0x2e3   :  { %2222 = vrcp.f32 %v930_v63  ;;  %v2221_v3 = vpop.eup %2220  ;;  %v943_v8 = vadd.f32 1.0, %v2219_v2 }
 0x2e4   :  { %2224 = vrcp.f32 %v936_v1  ;;  %v1513_v1 = vrot.slane %v634_v42, %v370_v56 }
 0x2e5   :  { %2226 = vrcp.f32 %v943_v8 }
 0x2ed   :  { %v2223_v5 = vpop.eup %2222 }
 0x2ee   :  { %v2225_v6 = vpop.eup %2224  ;;  %v947_v7 = vmul.f32 %v2223_v5, %v2221_v3 }
 0x2ef   :  { %v946_v9 = vmul.f32 %v2225_v6, %v630_v4  ;;  %v2227_v11 = vpop.eup %2226 }
 0x2f1   :  { %v948_v10 = vadd.f32 %v947_v7, %v946_v9  ;;  %v1211_v15 = vpop.f32.mrb[4].mxu1  ;;  %v1252_v19 = vpop.f32.mrb[8].mxu0 }
 0x2f2   :  { %v1213_v16 = vpop.f32.mrb[5].mxu1  ;;  %v1254_v20 = vpop.f32.mrb[9].mxu0 }
 0x2f3   :  { %2228 = vtanh.f32 %v948_v10  ;;  %1552 = vst [vmem:[#allocation19] sm:$0xff] %v948_v10  ;;  %v1215_v17 = vpop.f32.mrb[6].mxu1  ;;  %v1256_v21 = vpop.f32.mrb[10].mxu0  ;;  %v631_v10 = vld [vmem:[#allocation4 + $0x8] sm:$0xff] }
 0x2f4   :  { %v1216_v18 = vpop.f32.mrb[7].mxu1  ;;  %v1257_v22 = vpop.f32.mrb[11].mxu0 }
 0x2fd   :  { %v2229_v12 = vpop.eup %2228 }
 0x2fe   :  { %v950_v13 = vmul.f32 %v2229_v12, %v2227_v11 }
 0x300   :  { %v951_v14 = vpack.c.bf16 %v950_v13, %v950_v13  ;;  %1550 = vst [vmem:[#allocation17] sm:$0xff] %v950_v13 }
 0x302   :  { %1452 = vmatmul.mubr.bf16.vlgmr.msra.gmra.mrb[8].mxu1 %v951_v14  ;;  %1493 = vmatmul.mubr.bf16.vlgmr.msra.gmra.mrb[12].mxu0 %v951_v14 }
 0x303   :  { %1697 = vmatprep.mubr.bf16.mxu1 %v2491_v0  ;;  %1666 = vmatpush1.bf16.msra.mxu1 %v2190_v24  ;;  %v2201_v0 = vld [vmem:[#allocation15 + $0x34] ss:$8 sps:$4 sm:$0xff]  }
 0x304   :  { %1667 = vmatprep.subr.bf16.mxu1 %v2195_v25 }
 0x307   :  { %1668 = vmatpush1.bf16.msra.mxu1 %v2193_v26 }
 0x308   :  { %1669 = vmatprep.subr.bf16.mxu1 %v2198_v27 }
 0x30b   :  { %1670 = vmatpush1.bf16.msra.mxu1 %v2196_v28 }
 0x30c   :  { %1671 = vmatprep.subr.bf16.mxu1 %v2201_v0 }
 0x30f   :  { %1672 = vmatpush1.bf16.msra.mxu1 %v2199_v29 }
 0x310   :  { %1673 = vmatprep.subr.bf16.mxu1 %v2204_v30 }
 0x313   :  { %1674 = vmatpush1.bf16.msra.mxu1 %v2202_v31 }
 0x314   :  { %1675 = vmatprep.subr.bf16.mxu1 %v2207_v32 }
 0x317   :  { %1676 = vmatpush1.bf16.msra.mxu1 %v2205_v34 }
 0x318   :  { %1677 = vmatprep.subr.bf16.mxu1 %v2210_v35 }
 0x31b   :  { %1678 = vmatpush1.bf16.msra.mxu1 %v2208_v36 }
 0x31c   :  { %1679 = vmatprep.subr.bf16.mxu1 %v2213_v39 }
 0x31f   :  { %1680 = vmatpush1.bf16.msra.mxu1 %v2211_v41 }
 0x3d5   :  { %v1453_v44 = vpop.f32.mrb[8].mxu1  ;;  %v1494_v33 = vpop.f32.mrb[12].mxu0 }
 0x3d6   :  { %v1454_v47 = vadd.f32 %v1453_v44, %v1211_v15  ;;  %v1495_v48 = vadd.f32 %v1494_v33, %v1252_v19  ;;  %v1455_v49 = vpop.f32.mrb[9].mxu1  ;;  %v1496_v50 = vpop.f32.mrb[13].mxu0 }
 0x3d7   :  { %v1456_v51 = vadd.f32 %v1455_v49, %v1213_v16  ;;  %v1497_v52 = vadd.f32 %v1496_v50, %v1254_v20  ;;  %v1457_v53 = vpop.f32.mrb[10].mxu1  ;;  %v1498_v54 = vpop.f32.mrb[14].mxu0 }
 0x3d8   :  { %v1522_v55 = vadd.f32 %v1505_v43, %v1454_v47  ;;  %v1458_v57 = vpop.f32.mrb[11].mxu1  ;;  %v1499_v58 = vpop.f32.mrb[15].mxu0  ;;  %v1524_v3 = vadd.f32 %v1513_v1, %v1495_v48 }
 0x3d9   :  { %v1523_v59 = vadd.f32 %v1509_v46, %v1456_v51  ;;  %v1525_v63 = vadd.f32 %v1517_v62, %v1497_v52 }
 0x3da   :  { %v1910_v60 = vmul.f32 -1.442695, %v1522_v55 }
 0x3db   :  { %v1911_v61 = vmul.f32 -1.442695, %v1523_v59  ;;  %v1912_v2 = vmul.f32 -1.442695, %v1525_v63 }
 0x3dc   :  { %2230 = vpow2.f32 %v1910_v60 }
 0x3dd   :  { %2232 = vpow2.f32 %v1911_v61 }
 0x3de   :  { %2234 = vpow2.f32 %v1912_v2 }
 0x3df   :  { %2236 = vtanh.f32 %v1524_v3 }
 0x3e6   :  { %v2231_v4 = vpop.eup %2230 }
 0x3e7   :  { %v2233_v5 = vpop.eup %2232  ;;  %v1529_v6 = vadd.f32 1.0, %v2231_v4 }
 0x3e8   :  { %v1535_v7 = vadd.f32 1.0, %v2233_v5  ;;  %v2235_v8 = vpop.eup %2234 }
 0x3e9   :  { %2238 = vrcp.f32 %v1529_v6  ;;  %v2237_v9 = vpop.eup %2236  ;;  %v1542_v13 = vadd.f32 1.0, %v2235_v8 }
 0x3ea   :  { %2240 = vrcp.f32 %v1535_v7 }
 0x3eb   :  { %2242 = vrcp.f32 %v1542_v13 }
 0x3f3   :  { %v2239_v45 = vpop.eup %2238 }
 0x3f4   :  { %v2241_v11 = vpop.eup %2240  ;;  %v1546_v12 = vmul.f32 %v2239_v45, %v2237_v9 }
 0x3f5   :  { %v1545_v14 = vmul.f32 %v2241_v11, %v631_v10  ;;  %v2243_v56 = vpop.eup %2242 }
 0x3f7   :  { %v1547_v37 = vadd.f32 %v1546_v12, %v1545_v14 }
 0x3f9   :  { %1553 = vst [vmem:[#allocation19 + $0x8] sm:$0xff] %v1547_v37  ;;  %2244 = vtanh.f32 %v1547_v37 }
 0x403   :  { %v2245_v15 = vpop.eup %2244 }
 0x404   :  { %v1549_v16 = vmul.f32 %v2245_v15, %v2243_v56 }
 0x406   :  { %v1556_v17 = vpack.c.bf16 %v1549_v16, %v1549_v16  ;;  %1551 = vst [vmem:[#allocation17 + $0x8] sm:$0xff] %v1549_v16 }
 0x408   :  { %1698 = vmatmul.mubr.bf16.vlgmr.msra.gmra.mrb[12].mxu1 %v1556_v17 }
 0x409   :  { %2411 = shalt.err (!%p2408_p4)
}
 0x40a   :  { %s2412_s16 = scalar_lea.hbm %s2789_s13, 256 }
 0x40b   :  { %p2413_p5 = scmp.ne.s32.totalorder %s2789_s13, %s2412_s16  ;;  %p2416_p6 = scmp.lt.u32.totalorder %s2412_s16, %s2789_s13 }
 0x40d   :  { %p2418_p7 = pnand %p2416_p6, %p2413_p5 }
 0x40f   :  { %2421 = shalt.err (!%p2418_p7)
}
 0x410   :  { %1729 = dma.vmem_to_hbm [thread:$0]  %s1724_s4, 256, %s2789_s13, [#allocation18], %s2486_s8, %s2486_s8, %s2487_s15  }
 0x411   :  { %s2494_s28 = smov [#allocation19]  }
 0x412   :  { %s1735_s7 = sshll.u32 %s2494_s28, 4  ;;  %s1736_s7 = int_to_ptr.vmem [resolvable:$true] %s1735_s7 }
 0x413   :  { %s2422_s30 = scalar_lea.vmem %s1736_s7, 256  ;;  %p2427_p9 = scmp.lt.s32.totalorder %s1736_s7, %s1736_s7 }
 0x414   :  { %p2423_p8 = scmp.ne.s32.totalorder %s1736_s7, %s2422_s30  ;;  %p2428_p10 = scmp.lt.s32.totalorder %s2422_s30, %s2422_s30 }
 0x416   :  { %p2429_p11 = por %p2428_p10, %p2427_p9 }
 0x418   :  { %p2430_p12 = pnand %p2429_p11, %p2423_p8 }
 0x41a   :  { %2433 = shalt.err (!%p2430_p12)
}
 0x41b   :  { %s2434_s0 = scalar_lea.hbm %s2790_s14, 256 }
 0x41c   :  { %p2435_p13 = scmp.ne.s32.totalorder %s2790_s14, %s2434_s0  ;;  %p2438_p0 = scmp.lt.u32.totalorder %s2434_s0, %s2790_s14 }
 0x41e   :  { %p2440_p1 = pnand %p2438_p0, %p2435_p13 }
 0x420   :  { %2443 = shalt.err (!%p2440_p1)
}
 0x421   :  { %1741 = dma.vmem_to_hbm [thread:$0]  %s1736_s7, 256, %s2790_s14, [#allocation18], %s2486_s8, %s2486_s8, %s2487_s15  }
 0x422   :  { %v1573_v18 = vld [vmem:[%s2787_s11] sm:$0x3]  ;;  %s2495_s9 = smov [#allocation16]  }
 0x423   :  { %v1578_v19 = vrot.slane %v1573_v18, %v2703_v38  ;;  %v1582_v20 = vrot.slane %v1573_v18, %v2709_v40  ;;  %s1714_s4 = sshll.u32 %s2495_s9, 4  ;;  %s1715_s4 = int_to_ptr.vmem [resolvable:$true] %s1714_s4 }
 0x424   :  { %s2444_s14 = scalar_lea.vmem %s1715_s4, 256  ;;  %p2449_p3 = scmp.lt.s32.totalorder %s1715_s4, %s1715_s4 }
 0x425   :  { %p2445_p2 = scmp.ne.s32.totalorder %s1715_s4, %s2444_s14  ;;  %p2450_p4 = scmp.lt.s32.totalorder %s2444_s14, %s2444_s14 }
 0x427   :  { %p2451_p5 = por %p2450_p4, %p2449_p3 }
 0x429   :  { %p2452_p6 = pnand %p2451_p5, %p2445_p2 }
 0x4db   :  { %v1699_v21 = vpop.f32.mrb[12].mxu1 }
 0x4dc   :  { %v1700_v22 = vadd.f32 %v1699_v21, %v1578_v19  ;;  %v1701_v23 = vpop.f32.mrb[13].mxu1 }
 0x4dd   :  { %v1702_v24 = vadd.f32 %v1701_v23, %v1582_v20  ;;  %v1703_v25 = vpop.f32.mrb[14].mxu1 }
 0x4de   :  { %1706 = vst [vmem:[#allocation16] sm:$0xff] %v1700_v22  ;;  %v1704_v26 = vpop.f32.mrb[15].mxu1 }
 0x4df   :  { %1707 = vst [vmem:[#allocation16 + $0x8] sm:$0xff] %v1702_v24 }
 0x4e0   :  { %2455 = shalt.err (!%p2452_p6)
}
 0x4e1   :  { %s2456_s15 = scalar_lea.hbm %s2788_s12, 256 }
 0x4e2   :  { %p2457_p7 = scmp.ne.s32.totalorder %s2788_s12, %s2456_s15  ;;  %p2460_p8 = scmp.lt.u32.totalorder %s2456_s15, %s2788_s12 }
 0x4e4   :  { %p2462_p9 = pnand %p2460_p8, %p2457_p7 }
 0x4e6   :  { %2465 = shalt.err (!%p2462_p9)
}
 0x4e7   :  { %1717 = dma.vmem_to_hbm [thread:$0]  %s1715_s4, 256, %s2788_s12, [#allocation6]  }
 0x4e8   :  { %2474 = dma.done.wait [#allocation6], 256  }
 0x4e9   :  { %2475 = vsyncadd [#allocation6], 4294967040 }
 0x4ea   :  { %2476 = dma.done.wait [#allocation18], 512  }
 0x4eb   :  { %2477 = vsyncadd [#allocation18], 4294966784 }
 0x4ec   :  { %1751 = vsyncpa [#allocation5], 1 }
 0x4ed   :  { %1752 = vsyncpa [#allocation8], 1 }
 0x4ee   :  { %1753 = vsyncpa [#allocation11], 1 }
 0x4ef   :  { %1754 = vsyncpa [#allocation14], 1 }
 0x4f0   :  { %1755 = vsyncpa [#allocation6], 1 }
 0x4f1   :  { %1756 = vsyncpa [#allocation18], 1 }

</bundles_post_ra>
